<compile_context>
chip_gen: v7x
topology: tpu7x:2x2x1
jax: 0.10.0
libtpu: 0.0.40
codegen_flags: <defaults>
</compile_context>

<pallas_src>
import math

import jax
import jax.numpy as jnp
import numpy as np
from jax.experimental import pallas as pl
from jax.experimental.pallas import tpu as pltpu

activation_array = []  # mirrors the module-level logging list in the PyTorch spec


# --------------------------------------------------------------------------- utils
def _round_up(a, b):
    return ((a + b - 1) // b) * b


def _vmem_tile_bytes(shape, dtype):
    """Conservative VMEM footprint of one buffered tile ((sublane,128)-padded layout)."""
    itemsize = int(np.dtype(dtype).itemsize)
    sub = max(8, 32 // itemsize)          # 8 rows f32, 16 bf16, 32 int8
    s = list(shape)
    s[-1] = _round_up(s[-1], 128)
    if len(s) >= 2:
        s[-2] = _round_up(s[-2], sub)
    return int(np.prod(s)) * itemsize


def _tpu_info():
    try:
        return pltpu.get_tpu_info()
    except Exception:
        return None


def _vmem_capacity_bytes(info):
    if info is not None:
        for name in ("vmem_capacity_bytes", "vmem_bytes", "vmem_capacity"):
            v = getattr(info, name, None)
            if isinstance(v, (int, np.integer)) and v > 0:
                return int(v)
    return 64 * 1024 * 1024   # v7x per-TC physical -> safe lower bound on any gen


def _num_tensorcores(info):
    if info is not None:
        for name in ("num_cores", "num_tensorcores", "num_tensor_cores",
                     "tensorcore_count", "core_count"):
            v = getattr(info, name, None)
            if isinstance(v, (int, np.integer)) and v > 0:
                return max(1, min(int(v), 8))
    return 1


# ----------------------------------------------------------------- im2col fallback
def _matmul_kernel(p_ref, w_ref, o_ref):
    # p_ref: [tm, K] patch tile, w_ref: [K, Coutp] normalized weight, o_ref: [tm, Coutp].
    o_ref[...] = jnp.dot(
        p_ref[...], w_ref[...], preferred_element_type=jnp.float32
    ).astype(o_ref.dtype)


def _conv_im2col(x_nhwc, w_mat, *, N, C, H, W, Cout, Coutp, KH, KW, OH, OW,
                 sh, sw, ph, pw, dh, dw, out_dtype, tm_req, vmem_budget,
                 vmem_limit, num_cores):
    compute_dtype = x_nhwc.dtype
    fan_in = KH * KW * C
    xp = jnp.pad(x_nhwc, ((0, 0), (ph, ph), (pw, pw), (0, 0)))
    taps = []
    for i in range(KH):
        for j in range(KW):
            taps.append(xp[:, i * dh: i * dh + (OH - 1) * sh + 1: sh,
                            j * dw: j * dw + (OW - 1) * sw + 1: sw, :])
    patches = jnp.concatenate(taps, axis=-1).reshape(N * OH * OW, fan_in)
    M, K = patches.shape

    in_bytes = int(np.dtype(compute_dtype).itemsize)
    out_bytes = int(np.dtype(out_dtype).itemsize)

    # ---- row-tile selection: VMEM-budgeted, balanced grid, megacore aware ----
    M8 = _round_up(M, 8)
    w_vmem = 2 * _vmem_tile_bytes((K, Coutp), compute_dtype)     # grid-constant weight (2 bufs)
    per_row = (2 * _round_up(K, 128) * in_bytes
               + 2 * _round_up(Coutp, 128) * out_bytes)          # patches + output, double-buffered
    max_tm = max(8, ((vmem_budget - w_vmem) // per_row) // 8 * 8)
    tm_t = max(8, min(_round_up(tm_req, 8), max_tm, M8))
    g = -(-M8 // tm_t)
    if num_cores > 1:
        if g < 2 * num_cores and M8 >= 16 * num_cores:
            g = 2 * num_cores            # >=2 steps per TensorCore so DMA hides behind MXU
        g = _round_up(g, num_cores)      # balanced across cores
    tm = min(M8, _round_up(-(-M8 // g), 8))   # equalized tiles -> minimal padding
    g = -(-M8 // tm)                          # drop pure-padding trailing tiles
    Mp = g * tm
    if Mp != M:
        patches = jnp.pad(patches, ((0, Mp - M), (0, 0)))

    cost = pl.CostEstimate(
        flops=int(2 * Mp * K * Coutp),
        transcendentals=0,
        bytes_accessed=int(Mp * K * in_bytes + K * Coutp * in_bytes
                           + Mp * Coutp * out_bytes),
    )

    out_flat = pl.pallas_call(
        _matmul_kernel,
        out_shape=jax.ShapeDtypeStruct((Mp, Coutp), out_dtype),
        grid_spec=pltpu.PrefetchScalarGridSpec(
            num_scalar_prefetch=0,
            grid=(g,),
            in_specs=[
                pl.BlockSpec((tm, K), lambda i: (i, 0)),       # streamed patch tile
                pl.BlockSpec((K, Coutp), lambda i: (0, 0)),    # grid-constant weight
            ],
            out_specs=pl.BlockSpec((tm, Coutp), lambda i: (i, 0)),
        ),
        compiler_params=pltpu.CompilerParams(
            dimension_semantics=("parallel",),
            vmem_limit_bytes=int(vmem_limit),
        ),
        cost_estimate=cost,
    )(patches, w_mat)

    return out_flat[:M, :Cout].reshape(N, OH, OW, Cout).transpose(0, 3, 1, 2)


# --------------------------------------------------------------------- fused conv
def _conv_fused(x_nhwc, w_mat, *, N, C, H, W, Cout, Coutp, KH, KW, OH, OW,
                ph, pw, dh, dw, out_dtype, vmem_limit):
    """stride==1 conv computed directly from the padded input (no im2col in HBM)."""
    Hp, Wp = H + 2 * ph, W + 2 * pw
    xp = jnp.pad(x_nhwc, ((0, 0), (ph, ph), (pw, pw), (0, 0)))      # [N,Hp,Wp,C]
    fan_in = KH * KW * C
    OHOW = OH * OW

    def kernel(x_ref, w_ref, o_ref):
        # x_ref: [1,Hp,Wp,C], w_ref: [fan_in,Coutp], o_ref: [1,OHOW,Coutp]
        acc = jnp.zeros((OHOW, Coutp), jnp.float32)
        for t in range(KH * KW):
            i, j = t // KW, t % KW
            tap = x_ref[0, i * dh: i * dh + OH, j * dw: j * dw + OW, :]   # [OH,OW,C]
            acc = acc + jnp.dot(
                tap.reshape(OHOW, C),
                w_ref[t * C:(t + 1) * C, :],
                preferred_element_type=jnp.float32,
            )
        o_ref[0, :, :] = acc.astype(o_ref.dtype)

    in_bytes = int(np.dtype(x_nhwc.dtype).itemsize)
    out_bytes = int(np.dtype(out_dtype).itemsize)
    cost = pl.CostEstimate(
        flops=int(2 * N * OHOW * fan_in * Coutp),
        transcendentals=0,
        bytes_accessed=int(xp.size * in_bytes + w_mat.size * in_bytes
                           + N * OHOW * Coutp * out_bytes),
    )

    out = pl.pallas_call(
        kernel,
        out_shape=jax.ShapeDtypeStruct((N, OHOW, Coutp), out_dtype),
        grid_spec=pltpu.PrefetchScalarGridSpec(
            num_scalar_prefetch=0,
            grid=(N,),
            in_specs=[
                pl.BlockSpec((1, Hp, Wp, C), lambda n: (n, 0, 0, 0)),  # one padded image
                pl.BlockSpec((fan_in, Coutp), lambda n: (0, 0)),       # grid-constant weight
            ],
            out_specs=pl.BlockSpec((1, OHOW, Coutp), lambda n: (n, 0, 0)),
        ),
        compiler_params=pltpu.CompilerParams(
            dimension_semantics=("parallel",),
            vmem_limit_bytes=int(vmem_limit),
        ),
        cost_estimate=cost,
    )(xp, w_mat)

    return out[:, :, :Cout].reshape(N, OH, OW, Cout).transpose(0, 3, 1, 2)


# ------------------------------------------------------------------------ wrapper
def conv2d_normalized(x, weight, *, stride=(1, 1), padding=(0, 0), dilation=(1, 1),
                      eps=1e-4, tm=2048, compute_dtype=jnp.bfloat16, force_path=None):
    """Weight-normalized conv2d (groups=1, no bias). x: [N,C,H,W], weight: [Cout,Cin,KH,KW]."""
    N, C, H, W = x.shape
    Cout, Cin, KH, KW = weight.shape
    assert Cin == C, "groups != 1 not supported"   # TODO(synk): grouped conv
    sh, sw = stride
    ph, pw = padding
    dh, dw = dilation
    fan_in = Cin * KH * KW
    out_dtype = x.dtype

    OH = (H + 2 * ph - dh * (KH - 1) - 1) // sh + 1
    OW = (W + 2 * pw - dw * (KW - 1) - 1) // sw + 1

    # ---- weight normalization (hoisted, tiny, f32):
    #      normalize(w)/sqrt(fan_in) == w / (eps*sqrt(fan_in) + n)
    w32 = weight.astype(jnp.float32)
    n = jnp.sqrt(jnp.sum(w32 * w32, axis=(1, 2, 3), keepdims=True))   # [Cout,1,1,1]
    w_hat = w32 / (eps * math.sqrt(fan_in) + n)
    # K order = (i*KW + j)*C + c, matching the channel-last tap layout used below.
    w_mat = jnp.transpose(w_hat, (2, 3, 1, 0)).reshape(fan_in, Cout)

    # Output-channel padding policy: unpadded when Cout < 128 (block dim == full dim
    # is legal; avoids up-to-16x HBM writeback amplification), lane-multiple otherwise.
    Coutp = Cout if Cout < 128 else _round_up(Cout, 128)
    if Coutp != Cout:
        w_mat = jnp.pad(w_mat, ((0, 0), (0, Coutp - Cout)))
    w_mat = w_mat.astype(compute_dtype)
    # TODO(synk): keep w_mat in f32 (it is tiny) if strict f32 parity is required.

    # ---- per-generation VMEM budget / megacore info ----
    info = _tpu_info()
    vmem_cap = _vmem_capacity_bytes(info)
    vmem_limit = vmem_cap * 3 // 4          # raise scoped-VMEM limit (v5e default is 16 MiB)
    vmem_budget = vmem_limit * 4 // 5       # headroom for compiler-internal scratch
    num_cores = _num_tensorcores(info)

    x_nhwc = jnp.transpose(x, (0, 2, 3, 1)).astype(compute_dtype)     # [N,H,W,C]

    geom = dict(N=N, C=C, H=H, W=W, Cout=Cout, Coutp=Coutp, KH=KH, KW=KW,
                OH=OH, OW=OW, ph=ph, pw=pw, dh=dh, dw=dw, out_dtype=out_dtype)

    # ---- path choice: fused (no im2col HBM materialization) when it fits ----
    Hp, Wp = H + 2 * ph, W + 2 * pw
    fused_vmem = (2 * _vmem_tile_bytes((1, Hp, Wp, C), compute_dtype)
                  + 2 * _vmem_tile_bytes((fan_in, Coutp), compute_dtype)
                  + 2 * _vmem_tile_bytes((OH * OW, Coutp), out_dtype)
                  + 2 * _vmem_tile_bytes((OH * OW, Coutp), jnp.float32))  # f32 accumulator
    fused_ok = (sh == 1 and sw == 1)
    use_fused = fused_ok and fused_vmem <= vmem_budget
    if force_path == "fused":
        assert fused_ok, "fused path requires stride == (1, 1)"
        use_fused = True
    elif force_path == "im2col":
        use_fused = False

    if use_fused:
        return _conv_fused(x_nhwc, w_mat, vmem_limit=vmem_limit, **geom)

    return _conv_im2col(x_nhwc, w_mat, sh=sh, sw=sw, tm_req=tm,
                        vmem_budget=vmem_budget, vmem_limit=vmem_limit,
                        num_cores=num_cores, **geom)


# --------------------------------------------------------------------------- main
if __name__ == "__main__":
    # Module config: Conv2d(in_channels=4, out_channels=8, kernel_size=3, padding=1)
    in_channels, out_channels, ks, pad = 4, 8, 3, 1
    eps = 1e-4

    key = jax.random.PRNGKey(0)
    kx, kw_ = jax.random.split(key)
    x = jax.random.normal(kx, (2, in_channels, 16, 16), dtype=jnp.float32)
    # reset_parameters(): weight ~ N(0, 1)
    weight = jax.random.normal(kw_, (out_channels, in_channels, ks, ks), dtype=jnp.float32)

    # Default (fused) path and the im2col fallback path.
    y = conv2d_normalized(x, weight, stride=(1, 1), padding=(pad, pad),
                          dilation=(1, 1), eps=eps)
    y = jax.block_until_ready(y)
    y2 = conv2d_normalized(x, weight, stride=(1, 1), padding=(pad, pad),
                           dilation=(1, 1), eps=eps, force_path="im2col")
    y2 = jax.block_until_ready(y2)

    # Mirror of `activation_array.append(float(torch.mean(torch.abs(x))))` (logging only).
    activation_array.append(float(jnp.mean(jnp.abs(y))))

    # ---- reference weight, mirroring the PyTorch module exactly ----
    fan_in = in_channels * ks * ks
    n = jnp.sqrt(jnp.sum(weight ** 2, axis=(1, 2, 3), keepdims=True))
    alpha = math.sqrt(n.size / weight.size)                       # == 1/sqrt(fan_in)
    w_torch = (weight / (eps + alpha * n)) / math.sqrt(fan_in)    # normalize(w)/sqrt(fan_in)
    w_wrap = weight / (eps * math.sqrt(fan_in) + n)               # wrapper's algebraic form
    np.testing.assert_allclose(np.asarray(w_torch), np.asarray(w_wrap), rtol=1e-5, atol=1e-7)

    def conv_ref(xx, ww):
        return jax.lax.conv_general_dilated(
            xx, ww, window_strides=(1, 1), padding=[(pad, pad), (pad, pad)],
            rhs_dilation=(1, 1), dimension_numbers=("NCHW", "OIHW", "NCHW"),
            preferred_element_type=jnp.float32)

    # (a) Tight check on bf16-rounded inputs (isolates kernel math from streaming dtype).
    x_r = x.astype(jnp.bfloat16).astype(jnp.float32)
    w_r = w_wrap.astype(jnp.bfloat16).astype(jnp.float32)
    y_ref_b = conv_ref(x_r, w_r)
    np.testing.assert_allclose(np.asarray(y), np.asarray(y_ref_b), atol=2e-3, rtol=2e-3)
    np.testing.assert_allclose(np.asarray(y2), np.asarray(y_ref_b), atol=2e-3, rtol=2e-3)

    # (b) Looser check against the pure-f32 module semantics (bf16 rounding slack).
    y_ref_f = conv_ref(x, w_torch)
    np.testing.assert_allclose(np.asarray(y), np.asarray(y_ref_f), atol=5e-2, rtol=5e-2)
    np.testing.assert_allclose(np.asarray(y2), np.asarray(y_ref_f), atol=5e-2, rtol=5e-2)

    # Fused and fallback paths agree with each other.
    np.testing.assert_allclose(np.asarray(y), np.asarray(y2), atol=2e-3, rtol=2e-3)

    print("KERNEL_OK")
</pallas_src>

<mosaic_0001>
module attributes {stable_mosaic.version = 11 : i64} {
  func.func @kernel(%arg0: i32, %arg1: memref<1x18x18x4xbf16, #tpu.memory_space<vmem>>, %arg2: memref<36x8xbf16, #tpu.memory_space<vmem>>, %arg3: memref<1x256x8xf32, #tpu.memory_space<vmem>>) attributes {dimension_semantics = [#tpu.dimension_semantics<parallel>], iteration_bounds = array<i64: 2>, scalar_prefetch = 0 : i64, scratch_operands = 0 : i64, tpu.core_type = #tpu.core_type<tc>, window_params = [{transform_indices = @transform_0, window_bounds = array<i64: 1, 18, 18, 4>}, {pipeline_mode = #tpu.pipeline_mode<synchronous>, transform_indices = @transform_1, window_bounds = array<i64: 36, 8>}, {transform_indices = @transform_2, window_bounds = array<i64: 1, 256, 8>}]} {
    %cst = arith.constant 0.000000e+00 : f32
    %0 = vector.broadcast %cst : f32 to vector<256x8xf32>
    %c0 = arith.constant 0 : index
    %c0_0 = arith.constant 0 : index
    %c0_1 = arith.constant 0 : index
    %c0_2 = arith.constant 0 : index
    %1 = vector.load %arg1[%c0, %c0_0, %c0_1, %c0_2] : memref<1x18x18x4xbf16, #tpu.memory_space<vmem>>, vector<1x16x16x4xbf16>
    %2 = vector.shape_cast %1 : vector<1x16x16x4xbf16> to vector<16x16x4xbf16>
    %3 = vector.shape_cast %2 : vector<16x16x4xbf16> to vector<256x4xbf16>
    %c0_3 = arith.constant 0 : index
    %c0_4 = arith.constant 0 : index
    %4 = vector.load %arg2[%c0_3, %c0_4] : memref<36x8xbf16, #tpu.memory_space<vmem>>, vector<4x8xbf16>
    %cst_5 = arith.constant dense<0.000000e+00> : vector<256x8xf32>
    %5 = tpu.matmul %3, %4, %cst_5 {dimension_numbers = #tpu.dot_dimension_numbers<[1], [0], [0], [1], [0, 0, 1, 1], [], []>} : vector<256x4xbf16>, vector<4x8xbf16>, vector<256x8xf32> -> vector<256x8xf32>
    %6 = arith.addf %0, %5 : vector<256x8xf32>
    %c0_6 = arith.constant 0 : index
    %c0_7 = arith.constant 0 : index
    %c1 = arith.constant 1 : index
    %c0_8 = arith.constant 0 : index
    %7 = vector.load %arg1[%c0_6, %c0_7, %c1, %c0_8] : memref<1x18x18x4xbf16, #tpu.memory_space<vmem>>, vector<1x16x16x4xbf16>
    %8 = vector.shape_cast %7 : vector<1x16x16x4xbf16> to vector<16x16x4xbf16>
    %9 = vector.shape_cast %8 : vector<16x16x4xbf16> to vector<256x4xbf16>
    %c4 = arith.constant 4 : index
    %c0_9 = arith.constant 0 : index
    %10 = vector.load %arg2[%c4, %c0_9] : memref<36x8xbf16, #tpu.memory_space<vmem>>, vector<4x8xbf16>
    %cst_10 = arith.constant dense<0.000000e+00> : vector<256x8xf32>
    %11 = tpu.matmul %9, %10, %cst_10 {dimension_numbers = #tpu.dot_dimension_numbers<[1], [0], [0], [1], [0, 0, 1, 1], [], []>} : vector<256x4xbf16>, vector<4x8xbf16>, vector<256x8xf32> -> vector<256x8xf32>
    %12 = arith.addf %6, %11 : vector<256x8xf32>
    %c0_11 = arith.constant 0 : index
    %c0_12 = arith.constant 0 : index
    %c2 = arith.constant 2 : index
    %c0_13 = arith.constant 0 : index
    %13 = vector.load %arg1[%c0_11, %c0_12, %c2, %c0_13] : memref<1x18x18x4xbf16, #tpu.memory_space<vmem>>, vector<1x16x16x4xbf16>
    %14 = vector.shape_cast %13 : vector<1x16x16x4xbf16> to vector<16x16x4xbf16>
    %15 = vector.shape_cast %14 : vector<16x16x4xbf16> to vector<256x4xbf16>
    %c8 = arith.constant 8 : index
    %c0_14 = arith.constant 0 : index
    %16 = vector.load %arg2[%c8, %c0_14] : memref<36x8xbf16, #tpu.memory_space<vmem>>, vector<4x8xbf16>
    %cst_15 = arith.constant dense<0.000000e+00> : vector<256x8xf32>
    %17 = tpu.matmul %15, %16, %cst_15 {dimension_numbers = #tpu.dot_dimension_numbers<[1], [0], [0], [1], [0, 0, 1, 1], [], []>} : vector<256x4xbf16>, vector<4x8xbf16>, vector<256x8xf32> -> vector<256x8xf32>
    %18 = arith.addf %12, %17 : vector<256x8xf32>
    %c0_16 = arith.constant 0 : index
    %c1_17 = arith.constant 1 : index
    %c0_18 = arith.constant 0 : index
    %c0_19 = arith.constant 0 : index
    %19 = vector.load %arg1[%c0_16, %c1_17, %c0_18, %c0_19] : memref<1x18x18x4xbf16, #tpu.memory_space<vmem>>, vector<1x16x16x4xbf16>
    %20 = vector.shape_cast %19 : vector<1x16x16x4xbf16> to vector<16x16x4xbf16>
    %21 = vector.shape_cast %20 : vector<16x16x4xbf16> to vector<256x4xbf16>
    %c12 = arith.constant 12 : index
    %c0_20 = arith.constant 0 : index
    %22 = vector.load %arg2[%c12, %c0_20] : memref<36x8xbf16, #tpu.memory_space<vmem>>, vector<4x8xbf16>
    %cst_21 = arith.constant dense<0.000000e+00> : vector<256x8xf32>
    %23 = tpu.matmul %21, %22, %cst_21 {dimension_numbers = #tpu.dot_dimension_numbers<[1], [0], [0], [1], [0, 0, 1, 1], [], []>} : vector<256x4xbf16>, vector<4x8xbf16>, vector<256x8xf32> -> vector<256x8xf32>
    %24 = arith.addf %18, %23 : vector<256x8xf32>
    %c0_22 = arith.constant 0 : index
    %c1_23 = arith.constant 1 : index
    %c1_24 = arith.constant 1 : index
    %c0_25 = arith.constant 0 : index
    %25 = vector.load %arg1[%c0_22, %c1_23, %c1_24, %c0_25] : memref<1x18x18x4xbf16, #tpu.memory_space<vmem>>, vector<1x16x16x4xbf16>
    %26 = vector.shape_cast %25 : vector<1x16x16x4xbf16> to vector<16x16x4xbf16>
    %27 = vector.shape_cast %26 : vector<16x16x4xbf16> to vector<256x4xbf16>
    %c16 = arith.constant 16 : index
    %c0_26 = arith.constant 0 : index
    %28 = vector.load %arg2[%c16, %c0_26] : memref<36x8xbf16, #tpu.memory_space<vmem>>, vector<4x8xbf16>
    %cst_27 = arith.constant dense<0.000000e+00> : vector<256x8xf32>
    %29 = tpu.matmul %27, %28, %cst_27 {dimension_numbers = #tpu.dot_dimension_numbers<[1], [0], [0], [1], [0, 0, 1, 1], [], []>} : vector<256x4xbf16>, vector<4x8xbf16>, vector<256x8xf32> -> vector<256x8xf32>
    %30 = arith.addf %24, %29 : vector<256x8xf32>
    %c0_28 = arith.constant 0 : index
    %c1_29 = arith.constant 1 : index
    %c2_30 = arith.constant 2 : index
    %c0_31 = arith.constant 0 : index
    %31 = vector.load %arg1[%c0_28, %c1_29, %c2_30, %c0_31] : memref<1x18x18x4xbf16, #tpu.memory_space<vmem>>, vector<1x16x16x4xbf16>
    %32 = vector.shape_cast %31 : vector<1x16x16x4xbf16> to vector<16x16x4xbf16>
    %33 = vector.shape_cast %32 : vector<16x16x4xbf16> to vector<256x4xbf16>
    %c20 = arith.constant 20 : index
    %c0_32 = arith.constant 0 : index
    %34 = vector.load %arg2[%c20, %c0_32] : memref<36x8xbf16, #tpu.memory_space<vmem>>, vector<4x8xbf16>
    %cst_33 = arith.constant dense<0.000000e+00> : vector<256x8xf32>
    %35 = tpu.matmul %33, %34, %cst_33 {dimension_numbers = #tpu.dot_dimension_numbers<[1], [0], [0], [1], [0, 0, 1, 1], [], []>} : vector<256x4xbf16>, vector<4x8xbf16>, vector<256x8xf32> -> vector<256x8xf32>
    %36 = arith.addf %30, %35 : vector<256x8xf32>
    %c0_34 = arith.constant 0 : index
    %c2_35 = arith.constant 2 : index
    %c0_36 = arith.constant 0 : index
    %c0_37 = arith.constant 0 : index
    %37 = vector.load %arg1[%c0_34, %c2_35, %c0_36, %c0_37] : memref<1x18x18x4xbf16, #tpu.memory_space<vmem>>, vector<1x16x16x4xbf16>
    %38 = vector.shape_cast %37 : vector<1x16x16x4xbf16> to vector<16x16x4xbf16>
    %39 = vector.shape_cast %38 : vector<16x16x4xbf16> to vector<256x4xbf16>
    %c24 = arith.constant 24 : index
    %c0_38 = arith.constant 0 : index
    %40 = vector.load %arg2[%c24, %c0_38] : memref<36x8xbf16, #tpu.memory_space<vmem>>, vector<4x8xbf16>
    %cst_39 = arith.constant dense<0.000000e+00> : vector<256x8xf32>
    %41 = tpu.matmul %39, %40, %cst_39 {dimension_numbers = #tpu.dot_dimension_numbers<[1], [0], [0], [1], [0, 0, 1, 1], [], []>} : vector<256x4xbf16>, vector<4x8xbf16>, vector<256x8xf32> -> vector<256x8xf32>
    %42 = arith.addf %36, %41 : vector<256x8xf32>
    %c0_40 = arith.constant 0 : index
    %c2_41 = arith.constant 2 : index
    %c1_42 = arith.constant 1 : index
    %c0_43 = arith.constant 0 : index
    %43 = vector.load %arg1[%c0_40, %c2_41, %c1_42, %c0_43] : memref<1x18x18x4xbf16, #tpu.memory_space<vmem>>, vector<1x16x16x4xbf16>
    %44 = vector.shape_cast %43 : vector<1x16x16x4xbf16> to vector<16x16x4xbf16>
    %45 = vector.shape_cast %44 : vector<16x16x4xbf16> to vector<256x4xbf16>
    %c28 = arith.constant 28 : index
    %c0_44 = arith.constant 0 : index
    %46 = vector.load %arg2[%c28, %c0_44] : memref<36x8xbf16, #tpu.memory_space<vmem>>, vector<4x8xbf16>
    %cst_45 = arith.constant dense<0.000000e+00> : vector<256x8xf32>
    %47 = tpu.matmul %45, %46, %cst_45 {dimension_numbers = #tpu.dot_dimension_numbers<[1], [0], [0], [1], [0, 0, 1, 1], [], []>} : vector<256x4xbf16>, vector<4x8xbf16>, vector<256x8xf32> -> vector<256x8xf32>
    %48 = arith.addf %42, %47 : vector<256x8xf32>
    %c0_46 = arith.constant 0 : index
    %c2_47 = arith.constant 2 : index
    %c2_48 = arith.constant 2 : index
    %c0_49 = arith.constant 0 : index
    %49 = vector.load %arg1[%c0_46, %c2_47, %c2_48, %c0_49] : memref<1x18x18x4xbf16, #tpu.memory_space<vmem>>, vector<1x16x16x4xbf16>
    %50 = vector.shape_cast %49 : vector<1x16x16x4xbf16> to vector<16x16x4xbf16>
    %51 = vector.shape_cast %50 : vector<16x16x4xbf16> to vector<256x4xbf16>
    %c32 = arith.constant 32 : index
    %c0_50 = arith.constant 0 : index
    %52 = vector.load %arg2[%c32, %c0_50] : memref<36x8xbf16, #tpu.memory_space<vmem>>, vector<4x8xbf16>
    %cst_51 = arith.constant dense<0.000000e+00> : vector<256x8xf32>
    %53 = tpu.matmul %51, %52, %cst_51 {dimension_numbers = #tpu.dot_dimension_numbers<[1], [0], [0], [1], [0, 0, 1, 1], [], []>} : vector<256x4xbf16>, vector<4x8xbf16>, vector<256x8xf32> -> vector<256x8xf32>
    %54 = arith.addf %48, %53 : vector<256x8xf32>
    %c0_52 = arith.constant 0 : index
    %c0_53 = arith.constant 0 : index
    %c0_54 = arith.constant 0 : index
    %55 = vector.load %arg3[%c0_52, %c0_53, %c0_54] : memref<1x256x8xf32, #tpu.memory_space<vmem>>, vector<1x256x8xf32>
    %56 = vector.shape_cast %55 : vector<1x256x8xf32> to vector<256x8xf32>
    %57 = vector.shape_cast %54 : vector<256x8xf32> to vector<1x256x8xf32>
    tpu.vector_store %arg3[%c0_52, %c0_53, %c0_54], %57 {strides = array<i32>} : memref<1x256x8xf32, #tpu.memory_space<vmem>>, vector<1x256x8xf32>,
    return
  }
  func.func @transform_0(%arg0: i32) -> (i32, i32, i32, i32) {
    %c0_i32 = arith.constant 0 : i32
    %c0_i32_0 = arith.constant 0 : i32
    %c0_i32_1 = arith.constant 0 : i32
    %c0_i32_2 = arith.constant 0 : i32
    return %arg0, %c0_i32, %c0_i32_0, %c0_i32_1 : i32, i32, i32, i32
  }
  func.func @transform_1(%arg0: i32) -> (i32, i32) {
    %c0_i32 = arith.constant 0 : i32
    %c0_i32_0 = arith.constant 0 : i32
    %c0_i32_1 = arith.constant 0 : i32
    return %c0_i32, %c0_i32_0 : i32, i32
  }
  func.func @transform_2(%arg0: i32) -> (i32, i32, i32) {
    %c0_i32 = arith.constant 0 : i32
    %c0_i32_0 = arith.constant 0 : i32
    %c0_i32_1 = arith.constant 0 : i32
    return %arg0, %c0_i32, %c0_i32_0 : i32, i32, i32
  }
}

</mosaic_0001>

<bundles_post_ra>
// kernel: tpu_custom_call.1
= control target key start
LH: loop header
LB: loop body
LE: loop exit
PB: predicated region body
PF: predicated region fallthrough
CT: control target
= control target key end

     0   :  { %s6210_s9 = smov 0   ;;  %s8036_s0 = inlined_call_operand.vmem [shape: bf16[2,18,18,4], index: 0, kind: input, shape index: {}]   ;;  %s8037_s1 = inlined_call_operand.vmem [shape: bf16[36,8], index: 1, kind: input, shape index: {}]   ;;  %s8038_s2 = inlined_call_operand.vmem [shape: f32[2,256,8], index: 2, kind: output, shape index: {}]  }
   0x1 LB: > { %s4800_s10 = sadd.s32 4294967295, %s6193_s9   ;;  %p4804_p0 = scmp.ge.s32.totalorder %s6193_s9, 1  ;;  %s6193_s9 = sphi %s6210_s9, %s12_s9  }
   0x2   : > { %p112_p1 = scmp.lt.s32.totalorder %s6193_s9, 3 }
   0x4   : > { %p113_p2 = pnand %p4804_p0, %p112_p1 }
   0x6   : > { %116 = sbr.rel (%p113_p2) target bundleno = 585 (0x249), region = 28 }
   0xd   : > { %v6079_v0 = vld [vmem:[%s8037_s1] ss:$0 sps:$4 sm:$0xcc]   ;;  %vm683_vm0 = vcmask 1041408   ;;  %v2390_v1 = vld [vmem:[%s8037_s1 + $0x8] sm:$0x3] }
   0xe   : > { %p134_p3 = scmp.lt.s32.totalorder %s4800_s10, 1  ;;  %v633_v2 = vrot.slane %v6079_v0, 2  ;;  %6064 = vmatprep.subr.msk.bf16.mxu0 %vm683_vm0, %v2390_v1  ;;  %v6226_v3 = vsel %vm683_vm0, %v2390_v1, 0  ;;  %v177_v4 = vld [vmem:[%s8037_s1] sm:$0x3]  ;;  %vm634_vm3 = vcmask 31744  }
   0xf   : > { %8054 = vst [vmem:[#allocation2_spill] sm:$0xff] %v6226_v3  ;;  %5633 = vmatpush3.bf16.msra.mxu0 %v6226_v3  ;;  %v6080_v5 = vld [vmem:[%s8037_s1 + $0x8] ss:$0 sps:$4 sm:$0xcc]   ;;  %vm194_vm1 = vsmask.f32 3328 }
  0x10   : > { %s8111_s10 = smov (!%p134_p3, %s4800_s10), 1  ;;  %6060 = vmatprep.subr.msk.bf16.mxu1 %vm683_vm0, %v633_v2  ;;  %v685_v6 = vsel %vm683_vm0, %v633_v2, 0  ;;  %v2911_v7 = vrot.slane %v6080_v5, 2  ;;  %vm195_vm2 = vsmask.f32 7440  ;;  %v6258_v19 = vsel %vm683_vm0, %v177_v4, 0 }
  0x11   : > { %5497 = vmatpush3.bf16.msra.mxu1 %v685_v6  ;;  %s6070_s19 = smul.u32 216, %s8111_s10  ;;  %v6263_v24 = vld [vmem:[%s8037_s1 + $0xc] sm:$0x3]  ;;  %vm6271_vm4 = vmor %vm194_vm1, %vm195_vm2  ;;  %vm1188_vm5 = vcmask 1042432   ;;  %vm1189_vm6 = vcmask 1046532   ;;  %s5342_s11 = sshll.u32 %s8111_s10, 8 }
  0x12   : > { %6061 = vmatprep.subr.msk.bf16.mxu1 %vm683_vm0, %v177_v4  ;;  %6066 = vmatprep.subr.msk.bf16.mxu0 %vm683_vm0, %v2911_v7  ;;  %v6278_v39 = vsel %vm683_vm0, %v6263_v24, 0  ;;  %v6281_v43 = vsel %vm683_vm0, %v2911_v7, 0  ;;  %vm6497_vm7 = vmor %vm1188_vm5, %vm1189_vm6  ;;  %s7967_s14 = scalar_lea.vmem %s8038_s2, %s5342_s11  ;;  %vm4712_vm8 = vcmask 64512  }
  0x13   : > { %s6244_s22 = scalar_lea.vmem %s8036_s0, %s6070_s19 }
  0x14   : > { %v145_v8 = vld [vmem:[%s6244_s22] sm:$0xf]  ;;  %v146_v9 = vld [vmem:[%s6244_s22 + $0x4] sm:$0xf]  ;;  %v178_v10 = vld [vmem:[%s6244_s22 + $0x8] sm:$0x1] }
  0x15   : > { %v198_v11 = vshrl.u32 %v145_v8, 16  ;;  %v201_v12 = vshll.u32 %v145_v8, 16  ;;  %v207_v13 = vshll.u32 %v146_v9, 16  ;;  %v211_v14 = vshrl.u32 %v146_v9, 16  ;;  %v4986_v15 = vld [vmem:[%s6244_s22 + $0xc] sm:$0xf] }
  0x16   : > { %v217_v16 = vshll.u32 %v178_v10, 16  ;;  %v6252_v17 = vld [vmem:[%s6244_s22 + $0x10] sm:$0xf]  ;;  %v6255_v18 = vld [vmem:[%s6244_s22 + $0x14] sm:$0x1]  ;;  %v2007_v26 = vshrl.u32 %v4986_v15, 16 }
  0x17   : > { %v200_v20 = vrot.slane %v198_v11, 4  ;;  %v203_v21 = vrot.slane %v201_v12, 5  ;;  %v209_v22 = vrot.slane %v207_v13, 5  ;;  %v213_v23 = vrot.slane %v211_v14, 4  ;;  %v147_v33 = vld [vmem:[%s6244_s22 + $0xc] sm:$0xf] }
  0x18   : > { %v219_v25 = vrot.slane %v217_v16, 5  ;;  %v2010_v27 = vshll.u32 %v4986_v15, 16  ;;  %v2016_v28 = vshll.u32 %v6252_v17, 16  ;;  %v2020_v31 = vshrl.u32 %v6252_v17, 16  ;;  %v148_v38 = vld [vmem:[%s6244_s22 + $0x10] sm:$0xf] }
  0x19   : > { %v204_v29 = vor.u32 %v203_v21, %v200_v20  ;;  %v214_v30 = vor.u32 %v213_v23, %v209_v22  ;;  %v2026_v32 = vshll.u32 %v6255_v18, 16  ;;  %v2009_v35 = vrot.slane %v2007_v26, 4  ;;  %v179_v46 = vld [vmem:[%s6244_s22 + $0x14] sm:$0x1]  ;;  %v4989_v57 = vld [vmem:[%s6244_s22 + $0x18] sm:$0xf] }
  0x1a   : > { %v2012_v36 = vrot.slane %v2010_v27, 5  ;;  %v2018_v37 = vrot.slane %v2016_v28, 5  ;;  %v2022_v42 = vrot.slane %v2020_v31, 4  ;;  %v222_v47 = vshrl.u32 %v147_v33, 16  ;;  %v6290_v62 = vld [vmem:[%s6244_s22 + $0x1c] sm:$0xf] }
  0x1b   : > { %v205_v40 = vrot.slane %v204_v29, 4  ;;  %v215_v41 = vrot.slane %v214_v30, 4  ;;  %v2028_v45 = vrot.slane %v2026_v32, 5  ;;  %v225_v48 = vshll.u32 %v147_v33, 16  ;;  %v6298_v4 = vld [vmem:[%s6244_s22 + $0x20] sm:$0x1] }
  0x1c   : > { %v2013_v44 = vor.u32 %v2012_v36, %v2009_v35  ;;  %v2023_v51 = vor.u32 %v2022_v42, %v2018_v37  ;;  %v231_v52 = vshll.u32 %v148_v38, 16  ;;  %v224_v55 = vrot.slane %v222_v47, 4  ;;  %v149_v20 = vld [vmem:[%s6244_s22 + $0x18] sm:$0xf]  ;;  %v150_v26 = vld [vmem:[%s6244_s22 + $0x1c] sm:$0xf] }
  0x1d   : > { %v210_v49 = vsel %vm6271_vm4, %v205_v40, %v209_v22  ;;  %v220_v50 = vsel %vm6271_vm4, %v215_v41, %v219_v25  ;;  %v227_v56 = vrot.slane %v225_v48, 5  ;;  %v235_v60 = vshrl.u32 %v148_v38, 16  ;;  %v180_v33 = vld [vmem:[%s6244_s22 + $0x20] sm:$0x1]  ;;  %v4992_v42 = vld [vmem:[%s6244_s22 + $0x24] sm:$0xf] }
  0x1e   : > { %v4808_v53 = vcombine.low %v210_v49, %v220_v50  ;;  %v2014_v54 = vrot.slane %v2013_v44, 4  ;;  %v2024_v58 = vrot.slane %v2023_v51, 4  ;;  %v233_v59 = vrot.slane %v231_v52, 5  ;;  %v6321_v48 = vld [vmem:[%s6244_s22 + $0x28] sm:$0xf] }
  0x1f   : > { %v241_v61 = vshll.u32 %v179_v46, 16  ;;  %v2749_v0 = vrot.slane %v6252_v17, 5  ;;  %v2752_v1 = vrot.slane %v6255_v18, 5  ;;  %v228_v2 = vor.u32 %v227_v56, %v224_v55  ;;  %v6330_v56 = vld [vmem:[%s6244_s22 + $0x2c] sm:$0x1] }
  0x20   : > { %5498 = vmatprep.mubr.msk.bf16.mxu1 %vm634_vm3, %v4808_v53  ;;  %v2019_v63 = vsel %vm6271_vm4, %v2014_v54, %v2018_v37  ;;  %v2029_v5 = vsel %vm6271_vm4, %v2024_v58, %v2028_v45  ;;  %v237_v6 = vrot.slane %v235_v60, 4  ;;  %v2031_v8 = vshrl.u32 %v4989_v57, 16  ;;  %v1303_v53 = vld [vmem:[%s8037_s1 + $0x4] sm:$0x3]  ;;  %v6530_v18 = vld [vmem:[%s6244_s22 + $0x7c] sm:$0xf] }
  0x21   : > { %v243_v7 = vrot.slane %v241_v61, 5  ;;  %v5034_v9 = vcombine.low %v2019_v63, %v2029_v5  ;;  %v229_v10 = vrot.slane %v228_v2, 4  ;;  %v2034_v11 = vshll.u32 %v4989_v57, 16  ;;  %v151_v2 = vld [vmem:[%s6244_s22 + $0x24] sm:$0xf] }
  0x22   : > { %v2040_v12 = vshll.u32 %v6290_v62, 16  ;;  %v238_v13 = vor.u32 %v237_v6, %v233_v59  ;;  %v2033_v14 = vrot.slane %v2031_v8, 4  ;;  %v2044_v15 = vshrl.u32 %v6290_v62, 16 }
  0x23   : > { %v2050_v16 = vshll.u32 %v6298_v4, 16  ;;  %5634 = vmatprep.mubr.msk.bf16.mxu0 %vm634_vm3, %v5034_v9  ;;  %v234_v21 = vsel %vm6271_vm4, %v229_v10, %v233_v59  ;;  %v2036_v22 = vrot.slane %v2034_v11, 5  ;;  %v2756_v25 = vrot.slane %v6290_v62, 5  ;;  %v152_v9 = vld [vmem:[%s6244_s22 + $0x28] sm:$0xf] }
  0x24   : > { %v2042_v23 = vrot.slane %v2040_v12, 5  ;;  %v239_v27 = vrot.slane %v238_v13, 4  ;;  %v2046_v28 = vrot.slane %v2044_v15, 4  ;;  %v2759_v30 = vrot.slane %v6298_v4, 5  ;;  %v181_v15 = vld [vmem:[%s6244_s22 + $0x2c] sm:$0x1] }
  0x25   : > { %v2052_v29 = vrot.slane %v2050_v16, 5  ;;  %v2037_v31 = vor.u32 %v2036_v22, %v2033_v14  ;;  %v6314_v32 = vrot.slane %v2756_v25, 4  ;;  %v246_v35 = vshrl.u32 %v149_v20, 16 }
  0x26   : > { %v249_v36 = vshll.u32 %v149_v20, 16  ;;  %v244_v37 = vsel %vm6271_vm4, %v239_v27, %v243_v7  ;;  %v2047_v38 = vor.u32 %v2046_v28, %v2042_v23  ;;  %v255_v40 = vshll.u32 %v150_v26, 16  ;;  %v4995_v27 = vld [vmem:[%s6244_s22 + $0x30] sm:$0xf] }
  0x27   : > { %v259_v41 = vshrl.u32 %v150_v26, 16  ;;  %v4809_v44 = vcombine.low %v234_v21, %v244_v37  ;;  %v2038_v45 = vrot.slane %v2037_v31, 4  ;;  %v248_v46 = vrot.slane %v246_v35, 4  ;;  %v6350_v35 = vld [vmem:[%s6244_s22 + $0x34] sm:$0xf] }
  0x28   : > { %v251_v47 = vrot.slane %v249_v36, 5  ;;  %v2048_v49 = vrot.slane %v2047_v38, 4  ;;  %v257_v50 = vrot.slane %v255_v40, 5  ;;  %v265_v52 = vshll.u32 %v180_v33, 16 }
  0x29   : > { %v261_v51 = vrot.slane %v259_v41, 4  ;;  %5499 = vmatmul.mubr.msk.bf16.vlgmr.msra.gmra.mrb[0].mxu1 %vm634_vm3, %v4809_v44  ;;  %v2043_v54 = vsel %vm6271_vm4, %v2038_v45, %v2042_v23  ;;  %v2055_v57 = vshrl.u32 %v4992_v42, 16  ;;  %v2058_v58 = vshll.u32 %v4992_v42, 16  ;;  %v6358_v42 = vld [vmem:[%s6244_s22 + $0x38] sm:$0x1] }
  0x2a   : > { %v252_v55 = vor.u32 %v251_v47, %v248_v46  ;;  %5531 = vmatpush3.bf16.msra.mxu1 %v6258_v19  ;;  %v2053_v59 = vsel %vm6271_vm4, %v2048_v49, %v2052_v29  ;;  %v267_v61 = vrot.slane %v265_v52, 5  ;;  %v2064_v63 = vshll.u32 %v6321_v48, 16 }
  0x2b   : > { %v262_v60 = vor.u32 %v261_v51, %v257_v50  ;;  %v5035_v5 = vcombine.low %v2043_v54, %v2053_v59  ;;  %v2057_v7 = vrot.slane %v2055_v57, 4  ;;  %v2060_v8 = vrot.slane %v2058_v58, 5  ;;  %6062 = vmatprep.subr.msk.bf16.mxu1 %vm683_vm0, %v1303_v53  ;;  %v153_v54 = vld [vmem:[%s6244_s22 + $0x30] sm:$0xf] }
  0x2c   : > { %v253_v6 = vrot.slane %v252_v55, 4  ;;  %v2066_v11 = vrot.slane %v2064_v63, 5  ;;  %v2068_v19 = vshrl.u32 %v6321_v48, 16  ;;  %v2074_v12 = vshll.u32 %v6330_v56, 16 }
  0x2d   : > { %v263_v10 = vrot.slane %v262_v60, 4  ;;  %5635 = vmatmul.mubr.msk.bf16.vlgmr.msra.gmra.mrb[0].mxu0 %vm634_vm3, %v5035_v5  ;;  %v2061_v14 = vor.u32 %v2060_v8, %v2057_v7  ;;  %v270_v16 = vshrl.u32 %v151_v2, 16  ;;  %v273_v20 = vshll.u32 %v151_v2, 16  ;;  %v154_v60 = vld [vmem:[%s6244_s22 + $0x34] sm:$0xf] }
  0x2e   : > { %v258_v13 = vsel %vm6271_vm4, %v253_v6, %v257_v50  ;;  %5667 = vmatpush3.bf16.msra.mxu0 %v6281_v43  ;;  %v2070_v22 = vrot.slane %v2068_v19, 4  ;;  %v2076_v23 = vrot.slane %v2074_v12, 5  ;;  %v279_v26 = vshll.u32 %v152_v9, 16  ;;  %v182_v6 = vld [vmem:[%s6244_s22 + $0x38] sm:$0x1] }
  0x2f   : > { %v268_v21 = vsel %vm6271_vm4, %v263_v10, %v267_v61  ;;  %v2062_v29 = vrot.slane %v2061_v14, 4  ;;  %v272_v31 = vrot.slane %v270_v16, 4  ;;  %v275_v33 = vrot.slane %v273_v20, 5  ;;  %6067 = vmatprep.subr.msk.bf16.mxu0 %vm683_vm0, %v6263_v24  ;;  %v4998_v14 = vld [vmem:[%s6244_s22 + $0x3c] sm:$0xf] }
  0x30   : > { %v4810_v28 = vcombine.low %v258_v13, %v268_v21  ;;  %v2071_v36 = vor.u32 %v2070_v22, %v2066_v11  ;;  %v281_v37 = vrot.slane %v279_v26, 5  ;;  %v283_v43 = vshrl.u32 %v152_v9, 16  ;;  %v6375_v22 = vld [vmem:[%s6244_s22 + $0x40] sm:$0xf] }
  0x31   : > { %v289_v38 = vshll.u32 %v181_v15, 16  ;;  %v2067_v40 = vsel %vm6271_vm4, %v2062_v29, %v2066_v11  ;;  %v276_v41 = vor.u32 %v275_v33, %v272_v31  ;;  %v2079_v44 = vshrl.u32 %v4995_v27, 16 }
  0x32   : > { %5502 = vmatprep.mubr.msk.bf16.mxu1 %vm634_vm3, %v4810_v28  ;;  %v2082_v45 = vshll.u32 %v4995_v27, 16  ;;  %v2072_v46 = vrot.slane %v2071_v36, 4  ;;  %v285_v47 = vrot.slane %v283_v43, 4  ;;  %v2088_v24 = vshll.u32 %v6350_v35, 16  ;;  %v6380_v36 = vld [vmem:[%s6244_s22 + $0x44] sm:$0x1] }
  0x33   : > { %v291_v49 = vrot.slane %v289_v38, 5  ;;  %v277_v50 = vrot.slane %v276_v41, 4  ;;  %v2081_v51 = vrot.slane %v2079_v44, 4  ;;  %v2092_v53 = vshrl.u32 %v6350_v35, 16  ;;  %v155_v44 = vld [vmem:[%s6244_s22 + $0x3c] sm:$0xf] }
  0x34   : > { %v2084_v52 = vrot.slane %v2082_v45, 5  ;;  %v2077_v55 = vsel %vm6271_vm4, %v2072_v46, %v2076_v23  ;;  %v286_v57 = vor.u32 %v285_v47, %v281_v37  ;;  %v2090_v58 = vrot.slane %v2088_v24, 5  ;;  %v156_v24 = vld [vmem:[%s6244_s22 + $0x40] sm:$0xf] }
  0x35   : > { %v2098_v59 = vshll.u32 %v6358_v42, 16  ;;  %v5036_v61 = vcombine.low %v2067_v40, %v2077_v55  ;;  %v282_v63 = vsel %vm6271_vm4, %v277_v50, %v281_v37  ;;  %v2094_v5 = vrot.slane %v2092_v53, 4 }
  0x36   : > { %v2085_v2 = vor.u32 %v2084_v52, %v2081_v51  ;;  %v287_v7 = vrot.slane %v286_v57, 4  ;;  %v294_v9 = vshrl.u32 %v153_v54, 16  ;;  %v297_v10 = vshll.u32 %v153_v54, 16 }
  0x37   : > { %v2100_v8 = vrot.slane %v2098_v59, 5  ;;  %5638 = vmatprep.mubr.msk.bf16.mxu0 %vm634_vm3, %v5036_v61  ;;  %v2095_v19 = vor.u32 %v2094_v5, %v2090_v58  ;;  %v303_v12 = vshll.u32 %v154_v60, 16  ;;  %v307_v13 = vshrl.u32 %v154_v60, 16  ;;  %v5001_v5 = vld [vmem:[%s6244_s22 + $0x48] sm:$0xf] }
  0x38   : > { %v2086_v11 = vrot.slane %v2085_v2, 4  ;;  %v292_v15 = vsel %vm6271_vm4, %v287_v7, %v291_v49  ;;  %v296_v16 = vrot.slane %v294_v9, 4  ;;  %v299_v20 = vrot.slane %v297_v10, 5  ;;  %v6398_v10 = vld [vmem:[%s6244_s22 + $0x4c] sm:$0xf] }
  0x39   : > { %v313_v21 = vshll.u32 %v182_v6, 16  ;;  %v4811_v23 = vcombine.low %v282_v63, %v292_v15  ;;  %v2096_v27 = vrot.slane %v2095_v19, 4  ;;  %v305_v28 = vrot.slane %v303_v12, 5  ;;  %v183_v63 = vld [vmem:[%s6244_s22 + $0x44] sm:$0x1] }
  0x3a   : > { %v2091_v26 = vsel %vm6271_vm4, %v2086_v11, %v2090_v58  ;;  %v300_v29 = vor.u32 %v299_v20, %v296_v16  ;;  %v309_v31 = vrot.slane %v307_v13, 4  ;;  %v2103_v37 = vshrl.u32 %v4998_v14, 16 }
  0x3b   : > { %v315_v33 = vrot.slane %v313_v21, 5  ;;  %5503 = vmatmul.mubr.msk.bf16.gmra.mrb[4].mxu1 %vm634_vm3, %v4811_v23  ;;  %v2101_v43 = vsel %vm6271_vm4, %v2096_v27, %v2100_v8  ;;  %v2106_v38 = vshll.u32 %v4998_v14, 16  ;;  %v2112_v40 = vshll.u32 %v6375_v22, 16 }
  0x3c   : > { %v2116_v41 = vshrl.u32 %v6375_v22, 16  ;;  %v5037_v45 = vcombine.low %v2091_v26, %v2101_v43  ;;  %v301_v46 = vrot.slane %v300_v29, 4  ;;  %v310_v47 = vor.u32 %v309_v31, %v305_v28  ;;  %v6406_v26 = vld [vmem:[%s6244_s22 + $0x50] sm:$0x1]  ;;  %v6410_v29 = vld [vmem:[%s6244_s22 + $0x48] sm:$0xf] }
  0x3d   : > { %v2105_v49 = vrot.slane %v2103_v37, 4  ;;  %v2108_v50 = vrot.slane %v2106_v38, 5  ;;  %v2114_v51 = vrot.slane %v2112_v40, 5  ;;  %v2122_v53 = vshll.u32 %v6380_v36, 16  ;;  %v6413_v38 = vld [vmem:[%s6244_s22 + $0x4c] sm:$0xf] }
  0x3e   : > { %v2118_v52 = vrot.slane %v2116_v41, 4  ;;  %5639 = vmatmul.mubr.msk.bf16.gmra.mrb[4].mxu0 %vm634_vm3, %v5037_v45  ;;  %v306_v54 = vsel %vm6271_vm4, %v301_v46, %v305_v28  ;;  %v311_v55 = vrot.slane %v310_v47, 4  ;;  %v318_v57 = vshrl.u32 %v155_v44, 16 }
  0x3f   : > { %v321_v58 = vshll.u32 %v155_v44, 16  ;;  %v2109_v59 = vor.u32 %v2108_v50, %v2105_v49  ;;  %v2124_v61 = vrot.slane %v2122_v53, 5  ;;  %v327_v2 = vshll.u32 %v156_v24, 16 }
  0x40   : > { %v2119_v60 = vor.u32 %v2118_v52, %v2114_v51  ;;  %v316_v6 = vsel %vm6271_vm4, %v311_v55, %v315_v33  ;;  %v320_v7 = vrot.slane %v318_v57, 4  ;;  %v331_v9 = vshrl.u32 %v156_v24, 16  ;;  %v184_v24 = vld [vmem:[%s6244_s22 + $0x50] sm:$0x1]  ;;  %v5004_v55 = vld [vmem:[%s6244_s22 + $0x54] sm:$0xf] }
  0x41   : > { %v323_v8 = vrot.slane %v321_v58, 5  ;;  %v4812_v11 = vcombine.low %v306_v54, %v316_v6  ;;  %v2110_v19 = vrot.slane %v2109_v59, 4  ;;  %v329_v13 = vrot.slane %v327_v2, 5  ;;  %v6429_v6 = vld [vmem:[%s6244_s22 + $0x58] sm:$0xf] }
  0x42   : > { %v2120_v12 = vrot.slane %v2119_v60, 4  ;;  %v333_v15 = vrot.slane %v331_v9, 4  ;;  %v337_v16 = vshll.u32 %v183_v63, 16  ;;  %v2127_v20 = vshrl.u32 %v5001_v5, 16 }
  0x43   : > { %v324_v14 = vor.u32 %v323_v8, %v320_v7  ;;  %5506 = vmatprep.mubr.msk.bf16.mxu1 %vm634_vm3, %v4812_v11  ;;  %v2115_v21 = vsel %vm6271_vm4, %v2110_v19, %v2114_v51  ;;  %v2130_v27 = vshll.u32 %v5001_v5, 16  ;;  %v2136_v28 = vshll.u32 %v6398_v10, 16 }
  0x44   : > { %v2125_v23 = vsel %vm6271_vm4, %v2120_v12, %v2124_v61  ;;  %v334_v37 = vor.u32 %v333_v15, %v329_v13  ;;  %v339_v43 = vrot.slane %v337_v16, 5  ;;  %v2129_v40 = vrot.slane %v2127_v20, 4 }
  0x45   : > { %v5038_v31 = vcombine.low %v2115_v21, %v2125_v23  ;;  %v325_v33 = vrot.slane %v324_v14, 4  ;;  %v2132_v41 = vrot.slane %v2130_v27, 5  ;;  %v2138_v44 = vrot.slane %v2136_v28, 5  ;;  %v6435_v14 = vld [vmem:[%s6244_s22 + $0x5c] sm:$0x1] }
  0x46   : > { %v2140_v45 = vshrl.u32 %v6398_v10, 16  ;;  %v335_v47 = vrot.slane %v334_v37, 4  ;;  %v2146_v49 = vshll.u32 %v6406_v26, 16  ;;  %v342_v50 = vshrl.u32 %v6410_v29, 16  ;;  %v6439_v27 = vld [vmem:[%s6244_s22 + $0x54] sm:$0xf] }
  0x47   : > { %5642 = vmatprep.mubr.msk.bf16.mxu0 %vm634_vm3, %v5038_v31  ;;  %v330_v46 = vsel %vm6271_vm4, %v325_v33, %v329_v13  ;;  %v2133_v51 = vor.u32 %v2132_v41, %v2129_v40  ;;  %v345_v53 = vshll.u32 %v6410_v29, 16  ;;  %v351_v54 = vshll.u32 %v6413_v38, 16 }
  0x48   : > { %v2142_v52 = vrot.slane %v2140_v45, 4  ;;  %v340_v57 = vsel %vm6271_vm4, %v335_v47, %v339_v43  ;;  %v2148_v58 = vrot.slane %v2146_v49, 5  ;;  %v344_v59 = vrot.slane %v342_v50, 4  ;;  %v6445_v43 = vld [vmem:[%s6244_s22 + $0x58] sm:$0xf] }
  0x49   : > { %v355_v60 = vshrl.u32 %v6413_v38, 16  ;;  %v4813_v61 = vcombine.low %v330_v46, %v340_v57  ;;  %v2134_v63 = vrot.slane %v2133_v51, 4  ;;  %v347_v5 = vrot.slane %v345_v53, 5 }
  0x4a   : > { %v2143_v2 = vor.u32 %v2142_v52, %v2138_v44  ;;  %v353_v7 = vrot.slane %v351_v54, 5  ;;  %v361_v9 = vshll.u32 %v184_v24, 16  ;;  %v2151_v11 = vshrl.u32 %v5004_v55, 16  ;;  %v185_v24 = vld [vmem:[%s6244_s22 + $0x5c] sm:$0x1] }
  0x4b   : > { %v357_v8 = vrot.slane %v355_v60, 4  ;;  %5507 = vmatmul.mubr.msk.bf16.gmra.mrb[8].mxu1 %vm634_vm3, %v4813_v61  ;;  %v2139_v19 = vsel %vm6271_vm4, %v2134_v63, %v2138_v44  ;;  %v348_v13 = vor.u32 %v347_v5, %v344_v59  ;;  %v2154_v15 = vshll.u32 %v5004_v55, 16  ;;  %v5007_v55 = vld [vmem:[%s6244_s22 + $0x60] sm:$0xf]  ;;  %v6459_v61 = vld [vmem:[%s6244_s22 + $0x64] sm:$0xf] }
  0x4c   : > { %v2144_v12 = vrot.slane %v2143_v2, 4  ;;  %v363_v20 = vrot.slane %v361_v9, 5  ;;  %v2153_v21 = vrot.slane %v2151_v11, 4  ;;  %v2160_v23 = vshll.u32 %v6429_v6, 16  ;;  %v6466_v11 = vld [vmem:[%s6244_s22 + $0x68] sm:$0x1] }
  0x4d   : > { %v358_v16 = vor.u32 %v357_v8, %v353_v7  ;;  %v349_v31 = vrot.slane %v348_v13, 4  ;;  %v2156_v33 = vrot.slane %v2154_v15, 5  ;;  %v2164_v37 = vshrl.u32 %v6429_v6, 16 }
  0x4e   : > { %v2149_v28 = vsel %vm6271_vm4, %v2144_v12, %v2148_v58  ;;  %v2162_v44 = vrot.slane %v2160_v23, 5  ;;  %v2170_v45 = vshll.u32 %v6435_v14, 16  ;;  %v366_v50 = vshrl.u32 %v6439_v27, 16 }
  0x4f   : > { %v5039_v40 = vcombine.low %v2139_v19, %v2149_v28  ;;  %v359_v41 = vrot.slane %v358_v16, 4  ;;  %v354_v46 = vsel %vm6271_vm4, %v349_v31, %v353_v7  ;;  %v2157_v47 = vor.u32 %v2156_v33, %v2153_v21  ;;  %v6470_v21 = vld [vmem:[%s6244_s22 + $0x60] sm:$0xf] }
  0x50   : > { %v2166_v49 = vrot.slane %v2164_v37, 4  ;;  %v2172_v52 = vrot.slane %v2170_v45, 5  ;;  %v369_v53 = vshll.u32 %v6439_v27, 16  ;;  %v375_v54 = vshll.u32 %v6445_v43, 16  ;;  %v6476_v37 = vld [vmem:[%s6244_s22 + $0x64] sm:$0xf] }
  0x51   : > { %5643 = vmatmul.mubr.msk.bf16.gmra.mrb[8].mxu0 %vm634_vm3, %v5039_v40  ;;  %v364_v51 = vsel %vm6271_vm4, %v359_v41, %v363_v20  ;;  %v2158_v58 = vrot.slane %v2157_v47, 4  ;;  %v368_v60 = vrot.slane %v366_v50, 4  ;;  %v379_v5 = vshrl.u32 %v6445_v43, 16 }
  0x52   : > { %v4814_v57 = vcombine.low %v354_v46, %v364_v51  ;;  %v2167_v59 = vor.u32 %v2166_v49, %v2162_v44  ;;  %v371_v63 = vrot.slane %v369_v53, 5  ;;  %v377_v2 = vrot.slane %v375_v54, 5 }
  0x53   : > { %v385_v7 = vshll.u32 %v185_v24, 16  ;;  %v2163_v8 = vsel %vm6271_vm4, %v2158_v58, %v2162_v44  ;;  %v2175_v19 = vshrl.u32 %v5007_v55, 16  ;;  %v2178_v12 = vshll.u32 %v5007_v55, 16 }
  0x54   : > { %5510 = vmatprep.mubr.msk.bf16.mxu1 %vm634_vm3, %v4814_v57  ;;  %v2168_v9 = vrot.slane %v2167_v59, 4  ;;  %v372_v13 = vor.u32 %v371_v63, %v368_v60  ;;  %v381_v15 = vrot.slane %v379_v5, 4  ;;  %v2184_v20 = vshll.u32 %v6459_v61, 16  ;;  %v5066_v60 = vld [vmem:[%s6244_s22 + $0xc] sm:$0xe] }
  0x55   : > { %v387_v16 = vrot.slane %v385_v7, 5  ;;  %v2177_v28 = vrot.slane %v2175_v19, 4  ;;  %v2180_v31 = vrot.slane %v2178_v12, 5  ;;  %v2188_v33 = vshrl.u32 %v6459_v61, 16 }
  0x56   : > { %v2173_v23 = vsel %vm6271_vm4, %v2168_v9, %v2172_v52  ;;  %v373_v41 = vrot.slane %v372_v13, 4  ;;  %v382_v44 = vor.u32 %v381_v15, %v377_v2  ;;  %v2186_v45 = vrot.slane %v2184_v20, 5  ;;  %v186_v52 = vld [vmem:[%s6244_s22 + $0x68] sm:$0x1] }
  0x57   : > { %v5040_v40 = vcombine.low %v2163_v8, %v2173_v23  ;;  %v2181_v46 = vor.u32 %v2180_v31, %v2177_v28  ;;  %v2190_v47 = vrot.slane %v2188_v33, 4  ;;  %v2194_v49 = vshll.u32 %v6466_v11, 16  ;;  %v6504_v31 = vld [vmem:[%s6244_s22 + $0x70] sm:$0xf] }
  0x58   : > { %v390_v24 = vshrl.u32 %v6470_v21, 16  ;;  %v378_v50 = vsel %vm6271_vm4, %v373_v41, %v377_v2  ;;  %v383_v51 = vrot.slane %v382_v44, 4  ;;  %v393_v53 = vshll.u32 %v6470_v21, 16  ;;  %v6491_v2 = vld [vmem:[%s6244_s22 + $0x6c] sm:$0xf] }
  0x59   : > { %5646 = vmatprep.mubr.msk.bf16.mxu0 %vm634_vm3, %v5040_v40  ;;  %v399_v54 = vshll.u32 %v6476_v37, 16  ;;  %v2182_v55 = vrot.slane %v2181_v46, 4  ;;  %v2191_v57 = vor.u32 %v2190_v47, %v2186_v45  ;;  %v2196_v58 = vrot.slane %v2194_v49, 5 }
  0x5a   : > { %v392_v59 = vrot.slane %v390_v24, 4  ;;  %v388_v63 = vsel %vm6271_vm4, %v383_v51, %v387_v16  ;;  %v395_v5 = vrot.slane %v393_v53, 5  ;;  %v403_v8 = vshrl.u32 %v6476_v37, 16  ;;  %v187_v24 = vld [vmem:[%s6244_s22 + $0x74] sm:$0x1] }
  0x5b   : > { %v401_v7 = vrot.slane %v399_v54, 5  ;;  %v4815_v9 = vcombine.low %v378_v50, %v388_v63  ;;  %v2187_v19 = vsel %vm6271_vm4, %v2182_v55, %v2186_v45  ;;  %v2192_v12 = vrot.slane %v2191_v57, 4  ;;  %v5067_v50 = vld [vmem:[%s6244_s22 + $0x18] sm:$0xe] }
  0x5c   : > { %v409_v13 = vshll.u32 %v186_v52, 16  ;;  %v396_v16 = vor.u32 %v395_v5, %v392_v59  ;;  %v405_v20 = vrot.slane %v403_v8, 4  ;;  %v5082_v23 = vrot.slane %v5066_v60, 9  ;;  %v6523_v55 = vld [vmem:[%s6244_s22 + $0x78] sm:$0xf] }
  0x5d   : > { %v2751_v28 = vrot.slane %v2749_v0, 4  ;;  %5511 = vmatmul.mubr.msk.bf16.gmra.mrb[12].mxu1 %vm634_vm3, %v4815_v9  ;;  %v2197_v33 = vsel %vm6271_vm4, %v2192_v12, %v2196_v58  ;;  %v414_v41 = vshrl.u32 %v6491_v2, 16  ;;  %v417_v44 = vshll.u32 %v6491_v2, 16  ;;  %v188_v59 = vld [vmem:[%s6244_s22 + $0x80] sm:$0x1] }
  0x5e   : > { %v411_v40 = vrot.slane %v409_v13, 5  ;;  %v5041_v45 = vcombine.low %v2187_v19, %v2197_v33  ;;  %v397_v46 = vrot.slane %v396_v16, 4  ;;  %v406_v47 = vor.u32 %v405_v20, %v401_v7 }
  0x5f   : > { %v2750_v49 = vsel %vm6497_vm7, %v5082_v23, %v2749_v0  ;;  %v2753_v51 = vsel %vm6497_vm7, %v2751_v28, %v2752_v1  ;;  %v416_v52 = vrot.slane %v414_v41, 4  ;;  %v419_v53 = vrot.slane %v417_v44, 5  ;;  %v5068_v23 = vld [vmem:[%s6244_s22 + $0x24] sm:$0xe] }
  0x60   : > { %v423_v54 = vshll.u32 %v6504_v31, 16  ;;  %5647 = vmatmul.mubr.msk.bf16.gmra.mrb[12].mxu0 %vm634_vm3, %v5041_v45  ;;  %v402_v17 = vsel %vm6271_vm4, %v397_v46, %v401_v7  ;;  %v407_v57 = vrot.slane %v406_v47, 4  ;;  %v5098_v0 = vcombine.low %v2750_v49, %v2753_v51  ;;  %v6549_v41 = vld [vmem:[%s6244_s22 + $0x84] sm:$0xf] }
  0x61   : > { %v427_v58 = vshrl.u32 %v6504_v31, 16  ;;  %v420_v1 = vor.u32 %v419_v53, %v416_v52  ;;  %v433_v63 = vshll.u32 %v187_v24, 16  ;;  %v5083_v5 = vrot.slane %v5067_v50, 9  ;;  %v189_v53 = vld [vmem:[%s6244_s22 + $0x8c] sm:$0x1] }
  0x62   : > { %v425_v60 = vrot.slane %v423_v54, 5  ;;  %v412_v8 = vsel %vm6271_vm4, %v407_v57, %v411_v40  ;;  %5668 = vmatprep.mubr.msk.bf16.mxu0 %vm634_vm3, %v5098_v0  ;;  %v2760_v7 = vsel %vm6497_vm7, %v6314_v32, %v2759_v30  ;;  %v438_v19 = vshrl.u32 %v6523_v55, 16 }
  0x63   : > { %v429_v9 = vrot.slane %v427_v58, 4  ;;  %v4816_v12 = vcombine.low %v402_v17, %v412_v8  ;;  %v421_v13 = vrot.slane %v420_v1, 4  ;;  %v435_v16 = vrot.slane %v433_v63, 5  ;;  %v5069_v58 = vld [vmem:[%s6244_s22 + $0x30] sm:$0xe] }
  0x64   : > { %v2757_v20 = vsel %vm6497_vm7, %v5083_v5, %v2756_v25  ;;  %v440_v40 = vrot.slane %v438_v19, 4  ;;  %v441_v4 = vshll.u32 %v6523_v55, 16  ;;  %v447_v32 = vshll.u32 %v6530_v18, 16  ;;  %v6557_v25 = vld [vmem:[%s6244_s22 + $0x88] sm:$0xf] }
  0x65   : > { %v430_v28 = vor.u32 %v429_v9, %v425_v60  ;;  %v5099_v33 = vcombine.low %v2757_v20, %v2760_v7  ;;  %5514 = vmatprep.mubr.msk.bf16.mxu1 %vm634_vm3, %v4816_v12  ;;  %v426_v30 = vsel %vm6271_vm4, %v421_v13, %v425_v60  ;;  %v451_v62 = vshrl.u32 %v6530_v18, 16  ;;  %v6576_v9 = vld [vmem:[%s6244_s22 + $0x90] sm:$0xf] }
  0x66   : > { %v457_v44 = vshll.u32 %v188_v59, 16  ;;  %v443_v46 = vrot.slane %v441_v4, 5  ;;  %v5084_v47 = vrot.slane %v5068_v23, 9  ;;  %v2763_v49 = vrot.slane %v6321_v48, 5 }
  0x67   : > { %v431_v45 = vrot.slane %v430_v28, 4  ;;  %v449_v24 = vrot.slane %v447_v32, 5  ;;  %v453_v50 = vrot.slane %v451_v62, 4  ;;  %v2766_v52 = vrot.slane %v6330_v56, 5 }
  0x68   : > { %v459_v51 = vrot.slane %v457_v44, 5  ;;  %5669 = vmatmul.mubr.msk.bf16.vlgmr.msra.gmra.mrb[0].mxu0 %vm634_vm3, %v5099_v33  ;;  %v444_v17 = vor.u32 %v443_v46, %v440_v40  ;;  %v2764_v57 = vsel %vm6497_vm7, %v5084_v47, %v2763_v49  ;;  %v2765_v0 = vrot.slane %v2763_v49, 4  ;;  %v190_v46 = vld [vmem:[%s6244_s22 + $0x98] sm:$0x1]  ;;  %v5070_v47 = vld [vmem:[%s6244_s22 + $0x3c] sm:$0xe] }
  0x69   : > { %v436_v54 = vsel %vm6271_vm4, %v431_v45, %v435_v16  ;;  %5701 = vmatpush3.bf16.msra.mxu0 %v6278_v39  ;;  %v454_v48 = vor.u32 %v453_v50, %v449_v24  ;;  %v462_v1 = vshrl.u32 %v6549_v41, 16  ;;  %v465_v56 = vshll.u32 %v6549_v41, 16 }
  0x6a   : > { %v4817_v59 = vcombine.low %v426_v30, %v436_v54  ;;  %v445_v60 = vrot.slane %v444_v17, 4  ;;  %v2767_v63 = vsel %vm6497_vm7, %v2765_v0, %v2766_v52  ;;  %v471_v5 = vshll.u32 %v6557_v25, 16  ;;  %v6586_v30 = vld [vmem:[%s6244_s22 + $0x94] sm:$0xf] }
  0x6b   : > { %v475_v8 = vshrl.u32 %v6557_v25, 16  ;;  %v455_v7 = vrot.slane %v454_v48, 4  ;;  %v5100_v39 = vcombine.low %v2764_v57, %v2767_v63  ;;  %v464_v19 = vrot.slane %v462_v1, 4 }
  0x6c   : > { %5515 = vmatmul.mubr.msk.bf16.gmra.mrb[16].mxu1 %vm634_vm3, %v4817_v59  ;;  %v467_v12 = vrot.slane %v465_v56, 5  ;;  %v450_v13 = vsel %vm6271_vm4, %v445_v60, %v449_v24  ;;  %v473_v16 = vrot.slane %v471_v5, 5  ;;  %v481_v23 = vshll.u32 %v189_v53, 16  ;;  %v6608_v60 = vld [vmem:[%s6244_s22 + $0xa0] sm:$0xf] }
  0x6d   : > { %v477_v20 = vrot.slane %v475_v8, 4  ;;  %v460_v28 = vsel %vm6271_vm4, %v455_v7, %v459_v51  ;;  %5672 = vmatprep.mubr.msk.bf16.mxu0 %vm634_vm3, %v5100_v39  ;;  %v5085_v40 = vrot.slane %v5069_v58, 9  ;;  %v2770_v4 = vrot.slane %v6350_v35, 5  ;;  %v6603_v58 = vld [vmem:[%s6244_s22 + $0x9c] sm:$0xf] }
  0x6e   : > { %v468_v33 = vor.u32 %v467_v12, %v464_v19  ;;  %v4818_v32 = vcombine.low %v450_v13, %v460_v28  ;;  %v483_v44 = vrot.slane %v481_v23, 5  ;;  %v2773_v45 = vrot.slane %v6358_v42, 5  ;;  %v191_v39 = vld [vmem:[%s6244_s22 + $0xa4] sm:$0x1] }
  0x6f   : > { %v478_v62 = vor.u32 %v477_v20, %v473_v16  ;;  %v2771_v24 = vsel %vm6497_vm7, %v5085_v40, %v2770_v4  ;;  %v2772_v50 = vrot.slane %v2770_v4, 4  ;;  %v486_v51 = vshrl.u32 %v6576_v9, 16  ;;  %v5071_v40 = vld [vmem:[%s6244_s22 + $0x48] sm:$0xe] }
  0x70   : > { %v469_v49 = vrot.slane %v468_v33, 4  ;;  %5518 = vmatprep.mubr.msk.bf16.mxu1 %vm634_vm3, %v4818_v32  ;;  %v489_v52 = vshll.u32 %v6576_v9, 16  ;;  %v495_v53 = vshll.u32 %v6586_v30, 16  ;;  %v499_v42 = vshrl.u32 %v6586_v30, 16 }
  0x71   : > { %v479_v35 = vrot.slane %v478_v62, 4  ;;  %v2774_v17 = vsel %vm6497_vm7, %v2772_v50, %v2773_v45  ;;  %v488_v57 = vrot.slane %v486_v51, 4  ;;  %v505_v0 = vshll.u32 %v190_v46, 16  ;;  %v6627_v51 = vld [vmem:[%s6244_s22 + $0xa8] sm:$0xf] }
  0x72   : > { %v474_v54 = vsel %vm6271_vm4, %v469_v49, %v473_v16  ;;  %v5101_v48 = vcombine.low %v2771_v24, %v2774_v17  ;;  %v491_v1 = vrot.slane %v489_v52, 5  ;;  %v497_v56 = vrot.slane %v495_v53, 5 }
  0x73   : > { %v484_v59 = vsel %vm6271_vm4, %v479_v35, %v483_v44  ;;  %v501_v5 = vrot.slane %v499_v42, 4  ;;  %v507_v8 = vrot.slane %v505_v0, 5  ;;  %v5086_v7 = vrot.slane %v5070_v47, 9 }
  0x74   : > { %v4819_v63 = vcombine.low %v474_v54, %v484_v59  ;;  %5673 = vmatmul.mubr.msk.bf16.gmra.mrb[4].mxu0 %vm634_vm3, %v5101_v48  ;;  %v492_v19 = vor.u32 %v491_v1, %v488_v57  ;;  %v2777_v12 = vrot.slane %v6375_v22, 5  ;;  %v2780_v13 = vrot.slane %v6380_v36, 5  ;;  %v6632_v54 = vld [vmem:[%s6244_s22 + $0xac] sm:$0xf]  ;;  %v6637_v48 = vld [vmem:[%s6244_s22 + $0xb0] sm:$0x1] }
  0x75   : > { %v510_v16 = vshrl.u32 %v6603_v58, 16  ;;  %v502_v20 = vor.u32 %v501_v5, %v497_v56  ;;  %v513_v23 = vshll.u32 %v6603_v58, 16  ;;  %v519_v28 = vshll.u32 %v6608_v60, 16  ;;  %v5072_v1 = vld [vmem:[%s6244_s22 + $0x54] sm:$0xe] }
  0x76   : > { %5519 = vmatmul.mubr.msk.bf16.gmra.mrb[20].mxu1 %vm634_vm3, %v4819_v63  ;;  %v523_v33 = vshrl.u32 %v6608_v60, 16  ;;  %v493_v4 = vrot.slane %v492_v19, 4  ;;  %v2778_v32 = vsel %vm6497_vm7, %v5086_v7, %v2777_v12  ;;  %v2779_v22 = vrot.slane %v2777_v12, 4  ;;  %v6644_v7 = vld [vmem:[%s6244_s22 + $0xb4] sm:$0xf] }
  0x77   : > { %v512_v36 = vrot.slane %v510_v16, 4  ;;  %v503_v62 = vrot.slane %v502_v20, 4  ;;  %v515_v44 = vrot.slane %v513_v23, 5  ;;  %v521_v45 = vrot.slane %v519_v28, 5  ;;  %v6656_v23 = vld [vmem:[%s6244_s22 + $0xb8] sm:$0xf] }
  0x78   : > { %v525_v46 = vrot.slane %v523_v33, 4  ;;  %v498_v47 = vsel %vm6271_vm4, %v493_v4, %v497_v56  ;;  %v2781_v49 = vsel %vm6497_vm7, %v2779_v22, %v2780_v13  ;;  %v529_v24 = vshll.u32 %v191_v39, 16 }
  0x79   : > { %v5087_v50 = vrot.slane %v5071_v40, 9  ;;  %v508_v35 = vsel %vm6271_vm4, %v503_v62, %v507_v8  ;;  %v5102_v52 = vcombine.low %v2778_v32, %v2781_v49  ;;  %v516_v53 = vor.u32 %v515_v44, %v512_v36 }
  0x7a   : > { %v526_v42 = vor.u32 %v525_v46, %v521_v45  ;;  %v4820_v17 = vcombine.low %v498_v47, %v508_v35  ;;  %v531_v57 = vrot.slane %v529_v24, 5  ;;  %v2784_v0 = vrot.slane %v6398_v10, 5  ;;  %v193_v47 = vld [vmem:[%s6244_s22 + $0xbc] sm:$0x1] }
  0x7b   : > { %v2787_v59 = vrot.slane %v6406_v26, 5  ;;  %5676 = vmatprep.mubr.msk.bf16.mxu0 %vm634_vm3, %v5102_v52  ;;  %v517_v56 = vrot.slane %v516_v53, 4  ;;  %v534_v5 = vshrl.u32 %v6627_v51, 16  ;;  %v537_v8 = vshll.u32 %v6627_v51, 16  ;;  %v5073_v53 = vld [vmem:[%s6244_s22 + $0x60] sm:$0xe] }
  0x7c   : > { %v527_v63 = vrot.slane %v526_v42, 4  ;;  %5522 = vmatprep.mubr.msk.bf16.mxu1 %vm634_vm3, %v4820_v17  ;;  %v2785_v10 = vsel %vm6497_vm7, %v5087_v50, %v2784_v0  ;;  %v2786_v26 = vrot.slane %v2784_v0, 4  ;;  %v543_v39 = vshll.u32 %v6632_v54, 16 }
  0x7d   : > { %v547_v19 = vshrl.u32 %v6632_v54, 16  ;;  %v522_v12 = vsel %vm6271_vm4, %v517_v56, %v521_v45  ;;  %v536_v16 = vrot.slane %v534_v5, 4  ;;  %v539_v20 = vrot.slane %v537_v8, 5  ;;  %v5074_v56 = vld [vmem:[%s6244_s22 + $0x6c] sm:$0xe] }
  0x7e   : > { %v532_v13 = vsel %vm6271_vm4, %v527_v63, %v531_v57  ;;  %v2788_v33 = vsel %vm6497_vm7, %v2786_v26, %v2787_v59  ;;  %v545_v40 = vrot.slane %v543_v39, 5  ;;  %v553_v36 = vshll.u32 %v6637_v48, 16  ;;  %v5011_v26 = vld [vmem:[%s6244_s22 + $0x70] sm:$0xf]  ;;  %v5012_v39 = vld [vmem:[%s6244_s22 + $0x74] sm:$0x1] }
  0x7f   : > { %v4821_v28 = vcombine.low %v522_v12, %v532_v13  ;;  %v549_v4 = vrot.slane %v547_v19, 4  ;;  %v5103_v32 = vcombine.low %v2785_v10, %v2788_v33  ;;  %v540_v22 = vor.u32 %v539_v20, %v536_v16 }
  0x80   : > { %v5088_v62 = vrot.slane %v5072_v1, 9  ;;  %v2791_v45 = vrot.slane %v6429_v6, 5  ;;  %v2794_v46 = vrot.slane %v6435_v14, 5  ;;  %v558_v49 = vshrl.u32 %v6644_v7, 16 }
  0x81   : > { %5523 = vmatmul.mubr.msk.bf16.gmra.mrb[24].mxu1 %vm634_vm3, %v4821_v28  ;;  %v550_v44 = vor.u32 %v549_v4, %v545_v40  ;;  %5677 = vmatmul.mubr.msk.bf16.gmra.mrb[8].mxu0 %vm634_vm3, %v5103_v32  ;;  %v541_v24 = vrot.slane %v540_v22, 4  ;;  %v555_v50 = vrot.slane %v553_v36, 5  ;;  %v561_v35 = vshll.u32 %v6644_v7, 16 }
  0x82   : > { %v567_v52 = vshll.u32 %v6656_v23, 16  ;;  %v2792_v6 = vsel %vm6497_vm7, %v5088_v62, %v2791_v45  ;;  %v2793_v14 = vrot.slane %v2791_v45, 4  ;;  %v560_v17 = vrot.slane %v558_v49, 4 }
  0x83   : > { %v551_v42 = vrot.slane %v550_v44, 4  ;;  %v546_v57 = vsel %vm6271_vm4, %v541_v24, %v545_v40  ;;  %v563_v0 = vrot.slane %v561_v35, 5  ;;  %v571_v1 = vshrl.u32 %v6656_v23, 16  ;;  %v5075_v44 = vld [vmem:[%s6244_s22 + $0x78] sm:$0xe] }
  0x84   : > { %v569_v59 = vrot.slane %v567_v52, 5  ;;  %v2795_v5 = vsel %vm6497_vm7, %v2793_v14, %v2794_v46  ;;  %v577_v8 = vshll.u32 %v193_v47, 16  ;;  %v5089_v10 = vrot.slane %v5073_v53, 9  ;;  %v6131_v24 = vld [vmem:[%s6244_s22] sm:$0xf] }
  0x85   : > { %v556_v63 = vsel %vm6271_vm4, %v551_v42, %v555_v50  ;;  %v5104_v12 = vcombine.low %v2792_v6, %v2795_v5  ;;  %v564_v13 = vor.u32 %v563_v0, %v560_v17  ;;  %v573_v16 = vrot.slane %v571_v1, 4  ;;  %v6697_v50 = vld [vmem:[%s6244_s22 + $0x4] sm:$0xf]  ;;  %v6701_v52 = vld [vmem:[%s6244_s22 + $0x7c] sm:$0xf] }
  0x86   : > { %v4822_v19 = vcombine.low %v546_v57, %v556_v63  ;;  %v579_v20 = vrot.slane %v577_v8, 5  ;;  %v2798_v28 = vrot.slane %v6459_v61, 5  ;;  %v2801_v33 = vrot.slane %v6466_v11, 5  ;;  %v6704_v53 = vld [vmem:[%s6244_s22 + $0x80] sm:$0x1] }
  0x87   : > { %v5090_v40 = vrot.slane %v5074_v56, 9  ;;  %5680 = vmatprep.mubr.msk.bf16.mxu0 %vm634_vm3, %v5104_v12  ;;  %v565_v4 = vrot.slane %v564_v13, 4  ;;  %v574_v32 = vor.u32 %v573_v16, %v569_v59  ;;  %v2805_v22 = vrot.slane %v5011_v26, 5  ;;  %v5017_v42 = vld [vmem:[%s6244_s22 + $0x88] sm:$0xf] }
  0x88   : > { %5526 = vmatprep.mubr.msk.bf16.mxu1 %vm634_vm3, %v4822_v19  ;;  %v2808_v36 = vrot.slane %v5012_v39, 5  ;;  %v2799_v62 = vsel %vm6497_vm7, %v5089_v10, %v2798_v28  ;;  %v2800_v61 = vrot.slane %v2798_v28, 4  ;;  %v4841_v35 = vcombine.low %v6131_v24, %v6697_v50  ;;  %v5018_v0 = vld [vmem:[%s6244_s22 + $0x8c] sm:$0x1]  ;;  %v5020_v8 = vld [vmem:[%s6244_s22 + $0x94] sm:$0xf] }
  0x89   : > { %v570_v11 = vsel %vm6271_vm4, %v565_v4, %v569_v59  ;;  %v575_v45 = vrot.slane %v574_v32, 4  ;;  %v2806_v46 = vsel %vm6497_vm7, %v5090_v40, %v2805_v22  ;;  %v2807_v47 = vrot.slane %v2805_v22, 4  ;;  %v5076_v59 = vld [vmem:[%s6244_s22 + $0x84] sm:$0xe]  ;;  %v5077_v19 = vld [vmem:[%s6244_s22 + $0x90] sm:$0xe] }
  0x8a   : > { %v2802_v49 = vsel %vm6497_vm7, %v2800_v61, %v2801_v33  ;;  %v5091_v57 = vrot.slane %v5075_v44, 9  ;;  %v2812_v63 = vrot.slane %v6701_v52, 5  ;;  %v2815_v5 = vrot.slane %v6704_v53, 5  ;;  %v5021_v16 = vld [vmem:[%s6244_s22 + $0x98] sm:$0x1] }
  0x8b   : > { %v580_v6 = vsel %vm6271_vm4, %v575_v45, %v579_v20  ;;  %v5105_v14 = vcombine.low %v2799_v62, %v2802_v49  ;;  %v2809_v17 = vsel %vm6497_vm7, %v2807_v47, %v2808_v36  ;;  %v5092_v10 = vrot.slane %v5076_v59, 9  ;;  %v5023_v20 = vld [vmem:[%s6244_s22 + $0xa0] sm:$0xf]  ;;  %v5024_v4 = vld [vmem:[%s6244_s22 + $0xa4] sm:$0x1] }
  0x8c   : > { %v4823_v1 = vcombine.low %v570_v11, %v580_v6  ;;  %v5106_v56 = vcombine.low %v2806_v46, %v2809_v17  ;;  %v2819_v26 = vrot.slane %v5017_v42, 5  ;;  %v2822_v39 = vrot.slane %v5018_v0, 5  ;;  %v5078_v32 = vld [vmem:[%s6244_s22 + $0x9c] sm:$0xe]  ;;  %v6133_v22 = vld [vmem:[%s6244_s22 + $0xc] sm:$0xf] }
  0x8d   : > { %5681 = vmatmul.mubr.msk.bf16.gmra.mrb[12].mxu0 %vm634_vm3, %v5105_v14  ;;  %v2813_v12 = vsel %vm6497_vm7, %v5091_v57, %v2812_v63  ;;  %v2814_v13 = vrot.slane %v2812_v63, 4  ;;  %v2826_v40 = vrot.slane %v5020_v8, 5  ;;  %v6731_v36 = vld [vmem:[%s6244_s22 + $0x10] sm:$0xf]  ;;  %v6135_v44 = vld [vmem:[%s6244_s22 + $0x18] sm:$0xf] }
  0x8e   : > { %5527 = vmatmul.mubr.msk.bf16.gmra.mrb[28].mxu1 %vm634_vm3, %v4823_v1  ;;  %5684 = vmatprep.mubr.msk.bf16.mxu0 %vm634_vm3, %v5106_v56  ;;  %v2820_v28 = vsel %vm6497_vm7, %v5092_v10, %v2819_v26  ;;  %v2821_v33 = vrot.slane %v2819_v26, 4  ;;  %v4842_v62 = vcombine.low %v6133_v22, %v6731_v36  ;;  %v6738_v11 = vld [vmem:[%s6244_s22 + $0x1c] sm:$0xf]  ;;  %v5093_v46 = vrot.slane %v5077_v19, 9  ;;  %v5026_v57 = vld [vmem:[%s6244_s22 + $0xac] sm:$0xf] }
  0x8f   : > { %5532 = vmatprep.mubr.msk.bf16.mxu1 %vm634_vm3, %v4841_v35  ;;  %v2816_v61 = vsel %vm6497_vm7, %v2814_v13, %v2815_v5  ;;  %v4843_v45 = vcombine.low %v6135_v44, %v6738_v11  ;;  %v2828_v24 = vrot.slane %v2826_v40, 4  ;;  %v2829_v35 = vrot.slane %v5021_v16, 5  ;;  %v6137_v0 = vld [vmem:[%s8037_s1 + $0x4] sm:$0x3]  ;;  %v5029_v1 = vld [vmem:[%s6244_s22 + $0xb8] sm:$0xf] }
  0x90   : > { %v5107_v47 = vcombine.low %v2813_v12, %v2816_v61  ;;  %v2823_v49 = vsel %vm6497_vm7, %v2821_v33, %v2822_v39  ;;  %v5094_v6 = vrot.slane %v5078_v32, 9  ;;  %v2833_v14 = vrot.slane %v5023_v20, 5  ;;  %v5079_v8 = vld [vmem:[%s6244_s22 + $0xa8] sm:$0xe]  ;;  %v5027_v12 = vld [vmem:[%s6244_s22 + $0xb0] sm:$0x1] }
  0x91   : > { %v5108_v42 = vcombine.low %v2820_v28, %v2823_v49  ;;  %v2836_v17 = vrot.slane %v5024_v4, 5  ;;  %v1401_v59 = vsel %vm683_vm0, %v6137_v0, 0  ;;  %v2827_v63 = vsel %vm6497_vm7, %v5093_v46, %v2826_v40  ;;  %v6760_v26 = vld [vmem:[%s8037_s1 + $0xc] ss:$0 sps:$4 sm:$0xcc]  }
  0x92   : > { %v2835_v56 = vrot.slane %v2833_v14, 4  ;;  %v2830_v5 = vsel %vm6497_vm7, %v2828_v24, %v2829_v35  ;;  %v2840_v10 = vrot.slane %v5026_v57, 5  ;;  %v2834_v39 = vsel %vm6497_vm7, %v5094_v6, %v2833_v14  ;;  %v5030_v13 = vld [vmem:[%s6244_s22 + $0xbc] sm:$0x1]  ;;  %v5080_v20 = vld [vmem:[%s6244_s22 + $0xb4] sm:$0xe] }
  0x93   : > { %v2847_v16 = vrot.slane %v5029_v1, 5  ;;  %v6138_v28 = vld [vmem:[%s6244_s22 + $0x24] sm:$0xf]  ;;  %v6772_v33 = vld [vmem:[%s6244_s22 + $0x28] sm:$0xf]  ;;  %v5109_v4 = vcombine.low %v2827_v63, %v2830_v5  ;;  %v5095_v32 = vrot.slane %v5079_v8, 9 }
  0x94   : > { %v2837_v19 = vsel %vm6497_vm7, %v2835_v56, %v2836_v17  ;;  %v4844_v40 = vcombine.low %v6138_v28, %v6772_v33  ;;  %v5032_v22 = vld [vmem:[%s6244_s22 + $0xc4] sm:$0xf]  ;;  %v2842_v44 = vrot.slane %v2840_v10, 4  ;;  %v3998_v46 = vrot.slane %v6760_v26, 2  ;;  %v6784_v49 = vld [vmem:[%s6244_s22 + $0x34] sm:$0xf] }
  0x95   : > { %5685 = vmatmul.mubr.msk.bf16.gmra.mrb[16].mxu0 %vm634_vm3, %v5107_v47  ;;  %v5110_v61 = vcombine.low %v2834_v39, %v2837_v19  ;;  %v6140_v47 = vld [vmem:[%s6244_s22 + $0x30] sm:$0xf]  ;;  %v5096_v35 = vrot.slane %v5080_v20, 9  ;;  %v2850_v6 = vrot.slane %v5030_v13, 5  ;;  %v2841_v14 = vsel %vm6497_vm7, %v5095_v32, %v2840_v10  ;;  %v5033_v56 = vld [vmem:[%s6244_s22 + $0xc8] sm:$0x1] }
  0x96   : > { %5533 = vmatmul.mubr.msk.bf16.vlgmr.msra.gmra.mrb[0].mxu1 %vm634_vm3, %v4842_v62  ;;  %5688 = vmatprep.mubr.msk.bf16.mxu0 %vm634_vm3, %v5108_v42  ;;  %v6779_v62 = vld [vmem:[%s8037_s1 + $0x4] ss:$0 sps:$4 sm:$0xcc]   ;;  %v4845_v24 = vcombine.low %v6140_v47, %v6784_v49  ;;  %v2849_v42 = vrot.slane %v2847_v16, 4  ;;  %v2854_v57 = vrot.slane %v5032_v22, 5  ;;  %v4847_v20 = vcombine.low %v6410_v29, %v6413_v38 }
  0x97   : > { %5565 = vmatpush3.bf16.msra.mxu1 %v1401_v59  ;;  %5536 = vmatprep.mubr.msk.bf16.mxu1 %vm634_vm3, %v4843_v45  ;;  %v2843_v45 = vrot.slane %v5027_v12, 5  ;;  %v1713_v0 = vrot.slane %v6779_v62, 2  ;;  %v2848_v59 = vsel %vm6497_vm7, %v5096_v35, %v2847_v16  ;;  %v5081_v63 = vld [vmem:[%s6244_s22 + $0xc0] sm:$0xe]  ;;  %v6142_v5 = vld [vmem:[%s6244_s22 + $0x3c] sm:$0xf]  ;;  %v4848_v22 = vcombine.low %v6439_v27, %v6445_v43 }
  0x98   : > { %6068 = vmatprep.subr.msk.bf16.mxu0 %vm683_vm0, %v3998_v46  ;;  %v2851_v1 = vsel %vm6497_vm7, %v2849_v42, %v2850_v6  ;;  %v6810_v8 = vld [vmem:[%s6244_s22 + $0x40] sm:$0xf]  ;;  %v5097_v12 = vrot.slane %v5081_v63, 9  ;;  %v2856_v13 = vrot.slane %v2854_v57, 4  ;;  %v2857_v16 = vrot.slane %v5033_v56, 5  ;;  %v6093_v63 = vld [vmem:[%s6244_s22 + $0x24] sm:$0xff]  }
  0x99   : > { %v2844_v17 = vsel %vm6497_vm7, %v2842_v44, %v2843_v45  ;;  %6063 = vmatprep.subr.msk.bf16.mxu1 %vm683_vm0, %v1713_v0  ;;  %v4846_v10 = vcombine.low %v6142_v5, %v6810_v8  ;;  %v5112_v19 = vcombine.low %v2848_v59, %v2851_v1  ;;  %v2232_v28 = vshll.u32 %v6701_v52, 16  ;;  %v1141_v42 = vld [vmem:[%s6244_s22 + $0xc] sm:$0xe]  ;;  %v6144_v43 = vld [vmem:[%s6244_s22 + $0x8] sm:$0x1] }
  0x9a   : > { %v5111_v39 = vcombine.low %v2841_v14, %v2844_v17  ;;  %v2858_v32 = vsel %vm6497_vm7, %v2856_v13, %v2857_v16  ;;  %v1200_v44 = vrot.slane %v6731_v36, 5  ;;  %v4849_v45 = vcombine.low %v6470_v21, %v6476_v37  ;;  %v1142_v14 = vld [vmem:[%s6244_s22 + $0x18] sm:$0xe]  ;;  %v6145_v36 = vld [vmem:[%s6244_s22 + $0x14] sm:$0x1] }
  0x9b   : > { %v6825_v29 = vrot.slane %v2232_v28, 5  ;;  %v2242_v47 = vshll.u32 %v6704_v53, 16  ;;  %v1193_v35 = vrot.slane %v6697_v50, 5  ;;  %v1207_v27 = vrot.slane %v6738_v11, 5  ;;  %v6846_v53 = vld [vmem:[%s6244_s22 + $0x24] sm:$0xe] }
  0x9c   : > { %v1196_v21 = vrot.slane %v6144_v43, 5  ;;  %v4874_v50 = vrot.slane %v1141_v42, 9  ;;  %v1203_v17 = vrot.slane %v6145_v36, 5  ;;  %v1202_v1 = vrot.slane %v1200_v44, 4  ;;  %v6146_v13 = vld [vmem:[%s6244_s22 + $0x20] sm:$0x1] }
  0x9d   : > { %5689 = vmatmul.mubr.msk.bf16.gmra.mrb[20].mxu0 %vm634_vm3, %v5109_v4  ;;  %v2855_v4 = vsel %vm6497_vm7, %v5097_v12, %v2854_v57  ;;  %8059 = vst [vmem:[#allocation3_spill] sm:$0xff] %v6825_v29  ;;  %v6849_v57 = vrot.slane %v2242_v47, 5  ;;  %v1195_v59 = vrot.slane %v1193_v35, 4  ;;  %v4850_v11 = vcombine.low %v6491_v2, %v6504_v31  ;;  %v1144_v28 = vld [vmem:[%s6244_s22 + $0x30] sm:$0xe] }
  0x9e   : > { %5537 = vmatmul.mubr.msk.bf16.gmra.mrb[4].mxu1 %vm634_vm3, %v4844_v40  ;;  %5692 = vmatprep.mubr.msk.bf16.mxu0 %vm634_vm3, %v5110_v61  ;;  %v2236_v40 = vshrl.u32 %v6701_v52, 16  ;;  %v5113_v52 = vcombine.low %v2855_v4, %v2858_v32  ;;  %v6090_v61 = vld [vmem:[%s6244_s22 + $0x18] sm:$0xff]   ;;  %v4851_v5 = vcombine.low %v6523_v55, %v6530_v18  ;;  %v1209_v12 = vrot.slane %v1207_v27, 4  ;;  %v6147_v4 = vld [vmem:[%s6244_s22 + $0x2c] sm:$0x1] }
  0x9f   : > { %5540 = vmatprep.mubr.msk.bf16.mxu1 %vm634_vm3, %v4845_v24  ;;  %v1140_v24 = vld [vmem:[%s6244_s22] sm:$0xe]  ;;  %8060 = vst [vmem:[#allocation4_spill] sm:$0xff] %v6849_v57  ;;  %v1210_v16 = vrot.slane %v6146_v13, 5  ;;  %v4048_v2 = vsel %vm683_vm0, %v3998_v46, 0  ;;  %v6873_v55 = vsel %vm6497_vm7, %v4874_v50, %v1200_v44  ;;  %v4876_v18 = vrot.slane %v6846_v53, 9 }
  0xa0   : > { %v2238_v38 = vrot.slane %v2236_v40, 4  ;;  %v4873_v37 = vrot.slane %v1140_v24, 9  ;;  %v6877_v40 = vld [vmem:[%s6244_s22 + $0x3c] sm:$0xe]  ;;  %v6886_v26 = vsel %vm6497_vm7, %v1195_v59, %v1196_v21  ;;  %v6890_v46 = vsel %vm6497_vm7, %v1202_v1, %v1203_v17  ;;  %v5195_v24 = vld [vmem:[%s6244_s22 + $0x18] sm:$0xf] }
  0xa1   : > { %v1217_v32 = vrot.slane %v6147_v4, 5  ;;  %v4855_v44 = vcombine.low %v6627_v51, %v6632_v54  ;;  %v1228_v47 = vrot.slane %v6810_v8, 5  ;;  %v4856_v42 = vcombine.low %v6644_v7, %v6656_v23  ;;  %v5198_v43 = vld [vmem:[%s6244_s22 + $0x24] sm:$0xf]  ;;  %v6099_v21 = vld [vmem:[%s6244_s22 + $0x48] sm:$0xff]  }
  0xa2   : > { %v2239_v6 = vor.u32 %v2238_v38, %v6825_v29  ;;  %v6869_v31 = vsel %vm6497_vm7, %v4873_v37, %v1193_v35  ;;  %v1221_v38 = vrot.slane %v6784_v49, 5  ;;  %v6909_v49 = vsel %vm6497_vm7, %v1209_v12, %v1210_v16  ;;  %v6097_v35 = vld [vmem:[%s6244_s22 + $0x3c] sm:$0xff]   ;;  %v6148_v50 = vld [vmem:[%s6244_s22 + $0x38] sm:$0x1]  ;;  %v6149_v17 = vld [vmem:[%s6244_s22 + $0x44] sm:$0x1] }
  0xa3   : > { %v6925_v8 = vsel %vm683_vm0, %v1713_v0, 0  ;;  %v1224_v53 = vrot.slane %v6148_v50, 5  ;;  %v4878_v36 = vrot.slane %v6877_v40, 9  ;;  %v1231_v59 = vrot.slane %v6149_v17, 5  ;;  %v5199_v62 = vld [vmem:[%s6244_s22 + $0x28] sm:$0xf] }
  0xa4   : > { %v6851_v56 = vrot.slane %v2239_v6, 4  ;;  %v1223_v37 = vrot.slane %v1221_v38, 4  ;;  %v1230_v13 = vrot.slane %v1228_v47, 4  ;;  %v6151_v16 = vld [vmem:[%s6244_s22 + $0x50] sm:$0x1]  ;;  %v3587_v4 = vshrl.u32 %v5198_v43, 16 }
  0xa5   : > { %5693 = vmatmul.mubr.msk.bf16.gmra.mrb[24].mxu0 %vm634_vm3, %v5111_v39  ;;  %v6095_v39 = vld [vmem:[%s6244_s22 + $0x30] sm:$0xff]   ;;  %v3596_v50 = vshll.u32 %v5199_v62, 16  ;;  %v3600_v17 = vshrl.u32 %v5199_v62, 16  ;;  %v6107_v6 = vld [vmem:[%s6244_s22 + $0x78] sm:$0xff]   ;;  %v6108_v7 = vld [vmem:[%s6244_s22 + $0x84] sm:$0xff]  }
  0xa6   : > { %5541 = vmatmul.mubr.msk.bf16.gmra.mrb[8].mxu1 %vm634_vm3, %v4846_v10  ;;  %5696 = vmatprep.mubr.msk.bf16.mxu0 %vm634_vm3, %v5112_v19  ;;  %8061 = vst [vmem:[#allocation5_spill] sm:$0xff] %v6851_v56  ;;  %v4875_v10 = vrot.slane %v1142_v14, 9  ;;  %v4852_v19 = vcombine.low %v6549_v41, %v6557_v25  ;;  %v6982_v25 = vld [vmem:[%s6244_s22 + $0x60] sm:$0xe]  ;;  %v5201_v0 = vld [vmem:[%s6244_s22 + $0x30] sm:$0xf] }
  0xa7   : > { %5544 = vmatprep.mubr.msk.bf16.mxu1 %vm634_vm3, %v4847_v20  ;;  %v1214_v20 = vrot.slane %v6772_v33, 5  ;;  %v6882_v33 = vld [vmem:[%s8037_s1 + $0x10] sm:$0x3]  ;;  %v6988_v62 = vrot.slane %v3596_v50, 5  ;;  %v6155_v50 = vld [vmem:[%s6244_s22 + $0x68] sm:$0x1] }
  0xa8   : > { %v6165_v56 = vld [vmem:[%s6244_s22 + $0xa0] sm:$0xf] }
  0xa9   : > { %v6940_v1 = vsel %vm6497_vm7, %v4876_v18, %v1214_v20  ;;  %v1284_v57 = vrot.slane %v6165_v56, 5 }
  0xad   : > { %5697 = vmatmul.mubr.msk.bf16.gmra.mrb[28].mxu0 %vm634_vm3, %v5113_v52  ;;  %v1146_v52 = vld [vmem:[%s6244_s22 + $0x48] sm:$0xe] }
  0xae   : > { %5545 = vmatmul.mubr.msk.bf16.gmra.mrb[12].mxu1 %vm634_vm3, %v4848_v22  ;;  %5702 = vmatprep.mubr.msk.bf16.mxu0 %vm634_vm3, %v6090_v61  ;;  %v4853_v22 = vcombine.low %v6576_v9, %v6586_v30  ;;  %v4854_v61 = vcombine.low %v6603_v58, %v6608_v60  ;;  %v1216_v9 = vrot.slane %v1214_v20, 4  ;;  %v4877_v30 = vrot.slane %v1144_v28, 9 }
  0xaf   : > { %5548 = vmatprep.mubr.msk.bf16.mxu1 %vm634_vm3, %v4849_v45  ;;  %v6904_v45 = vsel %vm6497_vm7, %v4875_v10, %v1207_v27  ;;  %v5196_v27 = vld [vmem:[%s6244_s22 + $0x1c] sm:$0xf]  ;;  %v6944_v10 = vld [vmem:[%s6244_s22 + $0x54] sm:$0xe]  ;;  %v1238_v28 = vrot.slane %v6151_v16, 5  ;;  %v3566_v20 = vshll.u32 %v5195_v24, 16 }
  0xb0   : > { %v6952_v12 = vsel %vm6497_vm7, %v4877_v30, %v1221_v38  ;;  %v3572_v18 = vshll.u32 %v5196_v27, 16  ;;  %v3576_v40 = vshrl.u32 %v5196_v27, 16  ;;  %v6960_v38 = vsel %vm6497_vm7, %v1223_v37, %v1224_v53  ;;  %v6152_v30 = vld [vmem:[%s6244_s22 + $0x58] sm:$0xf]  ;;  %v6154_v16 = vld [vmem:[%s6244_s22 + $0x64] sm:$0xf] }
  0xb1   : > { %v6974_v27 = vsel %vm6497_vm7, %v1230_v13, %v1231_v59  ;;  %v4880_v41 = vrot.slane %v6944_v10, 9  ;;  %v6153_v10 = vld [vmem:[%s6244_s22 + $0x5c] sm:$0x1] }
  0xb2   : > { %v6986_v37 = vrot.slane %v3572_v18, 5  ;;  %v3578_v53 = vrot.slane %v3576_v40, 4  ;;  %v1245_v13 = vrot.slane %v6153_v10, 5  ;;  %v6103_v18 = vld [vmem:[%s6244_s22 + $0x60] sm:$0xff]   ;;  %v1149_v10 = vld [vmem:[%s6244_s22 + $0x6c] sm:$0xe] }
  0xb5   : > { %5703 = vmatmul.mubr.msk.bf16.vlgmr.msra.gmra.mrb[0].mxu0 %vm634_vm3, %v6093_v63  ;;  %v6150_v63 = vld [vmem:[%s6244_s22 + $0x4c] sm:$0xf] }
  0xb6   : > { %5549 = vmatmul.mubr.msk.bf16.gmra.mrb[16].mxu1 %vm634_vm3, %v4850_v11  ;;  %5735 = vmatpush3.bf16.msra.mxu0 %v4048_v2  ;;  %v4879_v11 = vrot.slane %v1146_v52, 9  ;;  %v3563_v2 = vshrl.u32 %v5195_v24, 16  ;;  %v3590_v52 = vshll.u32 %v5198_v43, 16  ;;  %v1242_v24 = vrot.slane %v6152_v30, 5 }
  0xb7   : > { %5552 = vmatprep.mubr.msk.bf16.mxu1 %vm634_vm3, %v4851_v5  ;;  %5706 = vmatprep.mubr.msk.bf16.mxu0 %vm634_vm3, %v6095_v39  ;;  %v1235_v5 = vrot.slane %v6150_v63, 5  ;;  %v6948_v39 = vsel %vm6497_vm7, %v1216_v9, %v1217_v32  ;;  %v6101_v63 = vld [vmem:[%s6244_s22 + $0x54] sm:$0xff]   ;;  %v3579_v30 = vor.u32 %v3578_v53, %v6986_v37 }
  0xb8   : > { %6069 = vmatprep.subr.msk.bf16.mxu0 %vm683_vm0, %v6882_v33  ;;  %v3592_v59 = vrot.slane %v3590_v52, 5  ;;  %v4881_v52 = vrot.slane %v6982_v25, 9  ;;  %v1150_v53 = vld [vmem:[%s6244_s22 + $0x78] sm:$0xe]  ;;  %v8074_v56 = vcombine.low %v6940_v1, %v6948_v39  ;;  %v6166_v1 = vld [vmem:[%s6244_s22 + $0xa4] sm:$0x1] }
  0xb9   : > { %v1237_v9 = vrot.slane %v1235_v5, 4  ;;  %v6978_v43 = vsel %vm6497_vm7, %v4879_v11, %v1235_v5  ;;  %v3602_v11 = vrot.slane %v3600_v17, 4  ;;  %v1252_v17 = vrot.slane %v6155_v50, 5  ;;  %v6157_v50 = vld [vmem:[%s6244_s22 + $0x7c] sm:$0xf] }
  0xba   : > { %v3580_v58 = vrot.slane %v3579_v30, 4  ;;  %v1287_v39 = vrot.slane %v6166_v1, 5 }
  0xbb   : > { %v6993_v5 = vsel %vm6497_vm7, %v1237_v9, %v1238_v28 }
  0xbd   : > { %5707 = vmatmul.mubr.msk.bf16.gmra.mrb[4].mxu0 %vm634_vm3, %v6097_v35  ;;  %v6970_v35 = vsel %vm6497_vm7, %v4878_v36, %v1228_v47  ;;  %v3565_v47 = vrot.slane %v3563_v2, 4  ;;  %v3589_v36 = vrot.slane %v3587_v4, 4  ;;  %v1249_v2 = vrot.slane %v6154_v16, 5  ;;  %v6156_v16 = vld [vmem:[%s6244_s22 + $0x70] sm:$0xf] }
  0xbe   : > { %5553 = vmatmul.mubr.msk.bf16.gmra.mrb[20].mxu1 %vm634_vm3, %v4852_v19  ;;  %5710 = vmatprep.mubr.msk.bf16.mxu0 %vm634_vm3, %v6099_v21  ;;  %v5197_v19 = vld [vmem:[%s6244_s22 + $0x20] sm:$0x1]  ;;  %v3568_v21 = vrot.slane %v3566_v20, 5  ;;  %v5200_v20 = vld [vmem:[%s6244_s22 + $0x2c] sm:$0x1]  ;;  %v1256_v32 = vrot.slane %v6156_v16, 5  ;;  %v3603_v4 = vor.u32 %v3602_v11, %v6988_v62 }
  0xbf   : > { %5556 = vmatprep.mubr.msk.bf16.mxu1 %vm634_vm3, %v4853_v22  ;;  %v1244_v22 = vrot.slane %v1242_v24, 4  ;;  %v3582_v28 = vshll.u32 %v5197_v19, 16  ;;  %v3593_v14 = vor.u32 %v3592_v59, %v3589_v36  ;;  %v3606_v25 = vshll.u32 %v5200_v20, 16 }
  0xc0   : > { %v3569_v9 = vor.u32 %v3568_v21, %v3565_v47  ;;  %v7015_v19 = vsel %vm6497_vm7, %v4880_v41, %v1242_v24  ;;  %v1251_v21 = vrot.slane %v1249_v2, 4  ;;  %v1263_v16 = vrot.slane %v6157_v50, 5  ;;  %v7029_v41 = vld [vmem:[%s6244_s22 + $0x34] sm:$0xf] }
  0xc1   : > { %v7019_v47 = vsel %vm6497_vm7, %v1244_v22, %v1245_v13  ;;  %v3584_v36 = vrot.slane %v3582_v28, 5  ;;  %v4882_v24 = vrot.slane %v1149_v10, 9  ;;  %8062 = vst [vmem:[#allocation6_spill] sm:$0xff] %v7029_v41  ;;  %v3611_v59 = vshrl.u32 %v5201_v0, 16  ;;  %v6105_v10 = vld [vmem:[%s6244_s22 + $0x6c] sm:$0xff]  }
  0xc2   : > { %v3614_v11 = vshll.u32 %v5201_v0, 16  ;;  %v1258_v60 = vrot.slane %v1256_v32, 4  ;;  %v3594_v13 = vrot.slane %v3593_v14, 4  ;;  %v3604_v20 = vrot.slane %v3603_v4, 4  ;;  %v6159_v0 = vld [vmem:[%s6244_s22 + $0x80] sm:$0x1] }
  0xc3   : > { %v4883_v28 = vrot.slane %v1150_v53, 9  ;;  %v1265_v50 = vrot.slane %v1263_v16, 4  ;;  %v1266_v40 = vrot.slane %v6159_v0, 5  ;;  %v3620_v51 = vshll.u32 %v7029_v41, 16  ;;  %v7048_v14 = vld [vmem:[%s6244_s22 + $0x38] sm:$0x1] }
  0xc4   : > { %v7045_v30 = vsel %vm6497_vm7, %v4881_v52, %v1249_v2  ;;  %8063 = vst [vmem:[#allocation7_spill] sm:$0xff] %v7048_v14  ;;  %v3613_v4 = vrot.slane %v3611_v59, 4  ;;  %v7052_v53 = vsel %vm6497_vm7, %v1251_v21, %v1252_v17  ;;  %v7059_v0 = vsel %vm6497_vm7, %v4882_v24, %v1256_v32  ;;  %v5204_v52 = vld [vmem:[%s6244_s22 + $0x3c] sm:$0xf] }
  0xc5   : > { %5711 = vmatmul.mubr.msk.bf16.gmra.mrb[8].mxu0 %vm634_vm3, %v6101_v63  ;;  %v3570_v63 = vrot.slane %v3569_v9, 4  ;;  %v3585_v59 = vsel %vm6271_vm4, %v3580_v58, %v3584_v36  ;;  %v3599_v17 = vsel %vm6271_vm4, %v3594_v13, %v6988_v62  ;;  %v7075_v32 = vsel %vm6497_vm7, %v4883_v28, %v1263_v16  ;;  %v7086_v62 = vld [vmem:[%s6244_s22 + $0x40] sm:$0xf] }
  0xc6   : > { %5557 = vmatmul.mubr.msk.bf16.gmra.mrb[24].mxu1 %vm634_vm3, %v4854_v61  ;;  %5714 = vmatprep.mubr.msk.bf16.mxu0 %vm634_vm3, %v6103_v18  ;;  %v6158_v61 = vld [vmem:[%s6244_s22 + $0x74] sm:$0x1]  ;;  %v3608_v18 = vrot.slane %v3606_v25, 5  ;;  %v3616_v25 = vrot.slane %v3614_v11, 5  ;;  %v7080_v21 = vsel %vm6497_vm7, %v1265_v50, %v1266_v40  ;;  %v7082_v24 = vrot.slane %v3620_v51, 5  ;;  %8064 = vst [vmem:[#allocation8_spill] sm:$0xff] %v7086_v62 }
  0xc7   : > { %5560 = vmatprep.mubr.msk.bf16.mxu1 %vm634_vm3, %v4855_v44  ;;  %v1259_v22 = vrot.slane %v6158_v61, 5  ;;  %v3624_v44 = vshrl.u32 %v7029_v41, 16  ;;  %v3575_v61 = vsel %vm6271_vm4, %v3570_v63, %v6986_v37  ;;  %v3630_v11 = vshll.u32 %v7048_v14, 16  ;;  %v1151_v63 = vld [vmem:[%s6244_s22 + $0x84] sm:$0xe] }
  0xc8   : > { %v3609_v37 = vsel %vm6271_vm4, %v3604_v20, %v3608_v18  ;;  %v3617_v16 = vor.u32 %v3616_v25, %v3613_v4  ;;  %v6160_v40 = vld [vmem:[%s6244_s22 + $0x88] sm:$0xf]  ;;  %v8065_v13 = vcombine.low %v6869_v31, %v6886_v26  ;;  %v7108_v20 = vsel %vm683_vm0, %v6882_v33, 0  ;;  %v7115_v26 = vld [vmem:[%s6244_s22 + $0x44] sm:$0x1] }
  0xc9   : > { %v7063_v2 = vsel %vm6497_vm7, %v1258_v60, %v1259_v22  ;;  %v3626_v36 = vrot.slane %v3624_v44, 4  ;;  %v1270_v58 = vrot.slane %v6160_v40, 5  ;;  %v3635_v60 = vshrl.u32 %v5204_v52, 16  ;;  %8066 = vst [vmem:[#allocation9_spill] sm:$0xff] %v7115_v26  ;;  %v5207_v50 = vld [vmem:[%s6244_s22 + $0x48] sm:$0xf] }
  0xca   : > { %v3638_v22 = vshll.u32 %v5204_v52, 16  ;;  %v7110_v18 = vcombine.low %v3599_v17, %v3609_v37  ;;  %v3644_v28 = vshll.u32 %v7086_v62, 16  ;;  %v7121_v51 = vld [vmem:[%s6244_s22 + $0x4c] sm:$0xf]  ;;  %v6109_v44 = vld [vmem:[%s6244_s22 + $0x90] sm:$0xff]   ;;  %v7125_v33 = vrot.slane %v3630_v11, 5 }
  0xcb   : > { %8067 = vst [vmem:[#allocation10_spill] sm:$0xff] %v7121_v51  ;;  %v3627_v4 = vor.u32 %v3626_v36, %v7082_v24  ;;  %v4884_v25 = vrot.slane %v1151_v63, 9  ;;  %v7129_v17 = vrot.slane %v3617_v16, 4  ;;  %v1272_v37 = vrot.slane %v1270_v58, 4  ;;  %v7132_v31 = vld [vmem:[%s6244_s22 + $0x58] sm:$0xf] }
  0xcc   : > { %v3637_v40 = vrot.slane %v3635_v60, 4  ;;  %8068 = vst [vmem:[#allocation11_spill] sm:$0xff] %v7132_v31  ;;  %v3662_v23 = vshll.u32 %v5207_v50, 16  ;;  %v3668_v9 = vshll.u32 %v7121_v51, 16  ;;  %v7136_v36 = vrot.slane %v3644_v28, 5 }
  0xcd   : > { %5715 = vmatmul.mubr.msk.bf16.gmra.mrb[12].mxu0 %vm634_vm3, %v6105_v10  ;;  %v3648_v10 = vshrl.u32 %v7086_v62, 16  ;;  %v3672_v62 = vshrl.u32 %v7121_v51, 16  ;;  %v7141_v16 = vsel %vm6497_vm7, %v4884_v25, %v1270_v58  ;;  %v3654_v60 = vshll.u32 %v7115_v26, 16  ;;  %v6162_v26 = vld [vmem:[%s6244_s22 + $0x94] sm:$0xf] }
  0xce   : > { %5561 = vmatmul.mubr.msk.bf16.gmra.mrb[28].mxu1 %vm634_vm3, %v4856_v42  ;;  %5718 = vmatprep.mubr.msk.bf16.mxu0 %vm634_vm3, %v6107_v6  ;;  %v7102_v42 = vcombine.low %v3575_v61, %v3585_v59  ;;  %v6161_v61 = vld [vmem:[%s6244_s22 + $0x8c] sm:$0x1]  ;;  %v5210_v59 = vld [vmem:[%s6244_s22 + $0x54] sm:$0xf]  ;;  %v3659_v6 = vshrl.u32 %v5207_v50, 16  ;;  %v3696_v50 = vshrl.u32 %v7132_v31, 16  ;;  %v8069_v28 = vcombine.low %v6873_v55, %v6890_v46 }
  0xcf   : > { %5566 = vmatprep.mubr.msk.bf16.mxu1 %vm634_vm3, %v8065_v13  ;;  %v1273_v52 = vrot.slane %v6161_v61, 5  ;;  %v3640_v13 = vrot.slane %v3638_v22, 5  ;;  %v3650_v11 = vrot.slane %v3648_v10, 4  ;;  %v3683_v63 = vshrl.u32 %v5210_v59, 16  ;;  %v7162_v55 = vld [vmem:[%s6244_s22 + $0x90] sm:$0xe] }
  0xd0   : > { %v3686_v61 = vshll.u32 %v5210_v59, 16  ;;  %v3692_v22 = vshll.u32 %v7132_v31, 16  ;;  %v7165_v46 = vld [vmem:[%s6244_s22 + $0x50] sm:$0x1]  ;;  %v3661_v59 = vrot.slane %v3659_v6, 4  ;;  %v3674_v58 = vrot.slane %v3672_v62, 4 }
  0xd1   : > { %v7159_v10 = vsel %vm6497_vm7, %v1272_v37, %v1273_v52  ;;  %v3641_v25 = vor.u32 %v3640_v13, %v3637_v40  ;;  %8070 = vst [vmem:[#allocation12_spill] sm:$0xff] %v7165_v46  ;;  %v5213_v52 = vld [vmem:[%s6244_s22 + $0x60] sm:$0xf]  ;;  %v6111_v40 = vld [vmem:[%s6244_s22 + $0xa8] sm:$0xff]   ;;  %v3651_v13 = vor.u32 %v3650_v11, %v7136_v36  ;;  %v3685_v14 = vrot.slane %v3683_v63, 4 }
  0xd2   : > { %v6110_v37 = vld [vmem:[%s6244_s22 + $0x9c] sm:$0xff]   ;;  %v3688_v41 = vrot.slane %v3686_v61, 5  ;;  %v3698_v6 = vrot.slane %v3696_v50, 4  ;;  %v3678_v63 = vshll.u32 %v7165_v46, 16  ;;  %v7194_v61 = vld [vmem:[%s6244_s22 + $0x64] sm:$0xf] }
  0xd3   : > { %v7187_v62 = vld [vmem:[%s6244_s22 + $0x5c] sm:$0x1]  ;;  %8073 = vst [vmem:[#allocation14_spill] sm:$0xff] %v7194_v61  ;;  %v3710_v29 = vshll.u32 %v5213_v52, 16  ;;  %v1154_v51 = vld [vmem:[%s6244_s22 + $0xa8] sm:$0xe] }
  0xd4   : > { %8072 = vst [vmem:[#allocation13_spill] sm:$0xff] %v7187_v62  ;;  %v3689_v50 = vor.u32 %v3688_v41, %v3685_v14  ;;  %v3680_v41 = vrot.slane %v3678_v63, 5  ;;  %v6112_v63 = vld [vmem:[%s6244_s22 + $0xb4] sm:$0xff]  }
  0xd5   : > { %5719 = vmatmul.mubr.msk.bf16.gmra.mrb[16].mxu0 %vm634_vm3, %v6108_v7  ;;  %v7155_v7 = vrot.slane %v3627_v4, 4  ;;  %v3664_v4 = vrot.slane %v3662_v23, 5  ;;  %v7189_v23 = vrot.slane %v3692_v22, 5  ;;  %v3652_v22 = vrot.slane %v3651_v13, 4 }
  0xd6   : > { %5567 = vmatmul.mubr.msk.bf16.vlgmr.msra.gmra.mrb[0].mxu1 %vm634_vm3, %v8069_v28  ;;  %5722 = vmatprep.mubr.msk.bf16.mxu0 %vm634_vm3, %v6109_v44  ;;  %v8071_v44 = vcombine.low %v6904_v45, %v6909_v49  ;;  %v7172_v28 = vrot.slane %v3668_v9, 5  ;;  %v6163_v45 = vld [vmem:[%s8037_s1 + $0x8] sm:$0x3]  ;;  %v7183_v49 = vrot.slane %v3654_v60, 5  ;;  %v4885_v9 = vrot.slane %v7162_v55, 9 }
  0xd7   : > { %5599 = vmatpush3.bf16.msra.mxu1 %v6925_v8  ;;  %v1277_v8 = vrot.slane %v6162_v26, 5  ;;  %v6164_v26 = vld [vmem:[%s6244_s22 + $0x98] sm:$0x1]  ;;  %v3665_v60 = vor.u32 %v3664_v4, %v3661_v59  ;;  %v1153_v55 = vld [vmem:[%s6244_s22 + $0x9c] sm:$0xe]  ;;  %v3699_v46 = vor.u32 %v3698_v6, %v7189_v23  ;;  %v3716_v59 = vshll.u32 %v7194_v61, 16 }
  0xd8   : > { %5570 = vmatprep.mubr.msk.bf16.mxu1 %vm634_vm3, %v8071_v44  ;;  %6065 = vmatprep.subr.msk.bf16.mxu1 %vm683_vm0, %v6163_v45  ;;  %v1280_v11 = vrot.slane %v6164_v26, 5  ;;  %v3707_v44 = vshrl.u32 %v5213_v52, 16  ;;  %v7196_v45 = vrot.slane %v3641_v25, 4  ;;  %v3675_v3 = vor.u32 %v3674_v58, %v7172_v28 }
  0xd9   : > { %v1279_v31 = vrot.slane %v1277_v8, 4  ;;  %v3702_v26 = vshll.u32 %v7187_v62, 16  ;;  %v1291_v25 = vrot.slane %v6632_v54, 5  ;;  %v3720_v58 = vshrl.u32 %v7194_v61, 16 }
  0xda   : > { %v4886_v14 = vrot.slane %v1153_v55, 9  ;;  %v3709_v4 = vrot.slane %v3707_v44, 4  ;;  %v3712_v52 = vrot.slane %v3710_v29, 5  ;;  %v3666_v54 = vrot.slane %v3665_v60, 4 }
  0xdb   : > { %v3676_v13 = vrot.slane %v3675_v3, 4  ;;  %v1286_v6 = vrot.slane %v1284_v57, 4  ;;  %v3704_v61 = vrot.slane %v3702_v26, 5  ;;  %v4887_v62 = vrot.slane %v1154_v51, 9 }
  0xdc   : > { %v3700_v29 = vrot.slane %v3699_v46, 4  ;;  %v1293_v44 = vrot.slane %v1291_v25, 4  ;;  %v7220_v55 = vrot.slane %v3716_v59, 5  ;;  %v3633_v3 = vsel %vm6271_vm4, %v7155_v7, %v7125_v33  ;;  %v7236_v46 = vld [vmem:[%s6244_s22 + $0x68] sm:$0x1] }
  0xdd   : > { %5723 = vmatmul.mubr.msk.bf16.gmra.mrb[20].mxu0 %vm634_vm3, %v6110_v37  ;;  %v8075_v37 = vcombine.low %v6952_v12, %v6960_v38  ;;  %v3722_v12 = vrot.slane %v3720_v58, 4  ;;  %v6113_v38 = vld [vmem:[%s6244_s22 + $0xc0] sm:$0xff]   ;;  %v3647_v51 = vsel %vm6271_vm4, %v7196_v45, %v7136_v36  ;;  %v3713_v60 = vor.u32 %v3712_v52, %v3709_v4  ;;  %v1155_v7 = vld [vmem:[%s6244_s22 + $0xb4] sm:$0xe]  ;;  %v6167_v59 = vld [vmem:[%s6244_s22 + $0xb8] sm:$0xf] }
  0xde   : > { %5571 = vmatmul.mubr.msk.bf16.gmra.mrb[4].mxu1 %vm634_vm3, %v8074_v56  ;;  %5726 = vmatprep.mubr.msk.bf16.mxu0 %vm634_vm3, %v6111_v40  ;;  %v3690_v56 = vrot.slane %v3689_v50, 4  ;;  %v1294_v40 = vrot.slane %v6637_v48, 5  ;;  %v7233_v48 = vsel %vm6497_vm7, %v4885_v9, %v1277_v8  ;;  %v3657_v50 = vsel %vm6271_vm4, %v3652_v22, %v7183_v49  ;;  %v5216_v9 = vld [vmem:[%s6244_s22 + $0x6c] sm:$0xf]  ;;  %v7302_v52 = vld [vmem:[%s6244_s22 + $0x70] sm:$0xf] }
  0xdf   : > { %5574 = vmatprep.mubr.msk.bf16.mxu1 %vm634_vm3, %v8075_v37  ;;  %v7243_v26 = vsel %vm6497_vm7, %v1279_v31, %v1280_v11  ;;  %v3671_v33 = vsel %vm6271_vm4, %v3666_v54, %v7172_v28  ;;  %v7250_v36 = vsel %vm6497_vm7, %v4886_v14, %v1284_v57  ;;  %v3681_v8 = vsel %vm6271_vm4, %v3676_v13, %v3680_v41  ;;  %v5219_v13 = vld [vmem:[%s6244_s22 + $0x78] sm:$0xf] }
  0xe0   : > { %v7257_v49 = vsel %vm6497_vm7, %v1286_v6, %v1287_v39  ;;  %v3695_v31 = vsel %vm6271_vm4, %v3690_v56, %v7189_v23  ;;  %v7264_v28 = vsel %vm6497_vm7, %v4887_v62, %v1291_v25  ;;  %v3705_v57 = vsel %vm6271_vm4, %v3700_v29, %v3704_v61  ;;  %v7315_v6 = vld [vmem:[%s6244_s22 + $0x7c] sm:$0xf]  ;;  %v5222_v29 = vld [vmem:[%s6244_s22 + $0x84] sm:$0xf] }
  0xe1   : > { %v7272_v11 = vsel %vm6497_vm7, %v1293_v44, %v1294_v40  ;;  %v3723_v45 = vor.u32 %v3722_v12, %v7220_v55  ;;  %v3726_v23 = vshll.u32 %v7236_v46, 16  ;;  %v8076_v62 = vcombine.low %v6970_v35, %v6974_v27  ;;  %8079 = vst [vmem:[#allocation15_spill] sm:$0xff] %v7315_v6  ;;  %v7322_v56 = vld [vmem:[%s6244_s22 + $0xbc] sm:$0x1]  ;;  %v7377_v44 = vld [vmem:[%s6244_s22 + $0x8c] sm:$0x1] }
  0xe2   : > { %v7283_v61 = vrot.slane %v3713_v60, 4  ;;  %v4888_v25 = vrot.slane %v1155_v7, 9  ;;  %v1298_v58 = vrot.slane %v6167_v59, 5  ;;  %v8077_v41 = vcombine.low %v6978_v43, %v6993_v5  ;;  %v6114_v43 = vld [vmem:[%s6244_s22 + $0xcc] sm:$0xff]  }
  0xe3   : > { %v8078_v35 = vsel %vm6271_vm4, %v7129_v17, %v7082_v24  ;;  %v7297_v14 = vcombine.low %v3647_v51, %v3657_v50  ;;  %v3731_v37 = vshrl.u32 %v5216_v9, 16  ;;  %v7305_v5 = vcombine.low %v3671_v33, %v3681_v8  ;;  %v7338_v51 = vld [vmem:[%s6244_s22 + $0x88] sm:$0xf]  ;;  %v5225_v60 = vld [vmem:[%s6244_s22 + $0x90] sm:$0xf] }
  0xe4   : > { %v7295_v27 = vcombine.low %v8078_v35, %v3633_v3  ;;  %v7309_v24 = vcombine.low %v3695_v31, %v3705_v57  ;;  %v7317_v1 = vrot.slane %v3723_v45, 4  ;;  %v7319_v39 = vrot.slane %v3726_v23, 5  ;;  %8080 = vst [vmem:[#allocation16_spill] sm:$0xff] %v7338_v51  ;;  %v7345_v31 = vld [vmem:[%s6244_s22 + $0x94] sm:$0xf] }
  0xe5   : > { %5727 = vmatmul.mubr.msk.bf16.gmra.mrb[24].mxu0 %vm634_vm3, %v6112_v63  ;;  %v3734_v63 = vshll.u32 %v5216_v9, 16  ;;  %v7332_v12 = vsel %vm6497_vm7, %v4888_v25, %v1298_v58  ;;  %v3740_v3 = vshll.u32 %v7302_v52, 16  ;;  %v7341_v50 = vrot.slane %v3731_v37, 4  ;;  %8081 = vst [vmem:[#allocation17_spill] sm:$0xff] %v7345_v31  ;;  %v7348_v9 = vld [vmem:[%s6244_s22 + $0x74] sm:$0x1] }
  0xe6   : > { %5575 = vmatmul.mubr.msk.bf16.gmra.mrb[8].mxu1 %vm634_vm3, %v8076_v62  ;;  %5730 = vmatprep.mubr.msk.bf16.mxu0 %vm634_vm3, %v6113_v38  ;;  %v7334_v38 = vrot.slane %v1298_v58, 4  ;;  %v3744_v33 = vshrl.u32 %v7302_v52, 16  ;;  %v3755_v7 = vshrl.u32 %v5219_v13, 16  ;;  %v3758_v8 = vshll.u32 %v5219_v13, 16 }
  0xe7   : > { %5578 = vmatprep.mubr.msk.bf16.mxu1 %vm634_vm3, %v8077_v41  ;;  %v3764_v57 = vshll.u32 %v7315_v6, 16  ;;  %v3768_v45 = vshrl.u32 %v7315_v6, 16  ;;  %v3779_v23 = vshrl.u32 %v5222_v29, 16  ;;  %v3782_v62 = vshll.u32 %v5222_v29, 16 }
  0xe8   : > { %v3788_v25 = vshll.u32 %v7338_v51, 16  ;;  %v3792_v59 = vshrl.u32 %v7338_v51, 16  ;;  %v3803_v58 = vshrl.u32 %v5225_v60, 16  ;;  %v3806_v41 = vshll.u32 %v5225_v60, 16 }
  0xe9   : > { %v8082_v35 = vcombine.low %v7015_v19, %v7019_v47  ;;  %v3736_v37 = vrot.slane %v3734_v63, 5  ;;  %v7361_v13 = vrot.slane %v3740_v3, 5  ;;  %v3812_v29 = vshll.u32 %v7345_v31, 16  ;;  %v5228_v3 = vld [vmem:[%s6244_s22 + $0x9c] sm:$0xf] }
  0xea   : > { %v3816_v17 = vshrl.u32 %v7345_v31, 16  ;;  %v8083_v60 = vcombine.low %v7045_v30, %v7052_v53  ;;  %v3746_v19 = vrot.slane %v3744_v33, 4  ;;  %v3750_v47 = vshll.u32 %v7348_v9, 16  ;;  %v7382_v30 = vld [vmem:[%s6244_s22 + $0x98] sm:$0x1] }
  0xeb   : > { %v3760_v63 = vrot.slane %v3758_v8, 5  ;;  %v3770_v54 = vrot.slane %v3768_v45, 4  ;;  %v3781_v4 = vrot.slane %v3779_v23, 4  ;;  %v3784_v22 = vrot.slane %v3782_v62, 5 }
  0xec   : > { %v7379_v40 = vrot.slane %v3788_v25, 5  ;;  %v3794_v31 = vrot.slane %v3792_v59, 4  ;;  %v3805_v53 = vrot.slane %v3803_v58, 4  ;;  %v3808_v33 = vrot.slane %v3806_v41, 5 }
  0xed   : > { %5731 = vmatmul.mubr.msk.bf16.gmra.mrb[28].mxu0 %vm634_vm3, %v6114_v43  ;;  %v7364_v43 = vld [vmem:[%s6244_s22 + $0x80] sm:$0x1]  ;;  %v3818_v51 = vrot.slane %v3816_v17, 4  ;;  %v3827_v8 = vshrl.u32 %v5228_v3, 16  ;;  %v3737_v45 = vor.u32 %v3736_v37, %v7341_v50  ;;  %v3747_v23 = vor.u32 %v3746_v19, %v7361_v13  ;;  %v5231_v37 = vld [vmem:[%s6244_s22 + $0xa8] sm:$0xf] }
  0xee   : > { %5579 = vmatmul.mubr.msk.bf16.gmra.mrb[12].mxu1 %vm634_vm3, %v8082_v35  ;;  %5736 = vmatprep.mubr.msk.bf16.mxu0 %vm634_vm3, %v7102_v42  ;;  %v3757_v42 = vrot.slane %v3755_v7, 4  ;;  %v7374_v35 = vrot.slane %v3764_v57, 5  ;;  %v7387_v7 = vld [vmem:[%s6244_s22 + $0xa0] sm:$0xf]  ;;  %v3830_v57 = vshll.u32 %v5228_v3, 16  ;;  %v3774_v25 = vshll.u32 %v7364_v43, 16 }
  0xef   : > { %5582 = vmatprep.mubr.msk.bf16.mxu1 %vm634_vm3, %v8083_v60  ;;  %v7384_v60 = vrot.slane %v3812_v29, 5  ;;  %8084 = vst [vmem:[#allocation18_spill] sm:$0xff] %v7387_v7  ;;  %v3752_v59 = vrot.slane %v3750_v47, 5  ;;  %v3785_v58 = vor.u32 %v3784_v22, %v3781_v4  ;;  %v3798_v41 = vshll.u32 %v7377_v44, 16 }
  0xf0   : > { %v3761_v62 = vor.u32 %v3760_v63, %v3757_v42  ;;  %v3771_v6 = vor.u32 %v3770_v54, %v7374_v35  ;;  %v3795_v17 = vor.u32 %v3794_v31, %v7379_v40  ;;  %v3809_v29 = vor.u32 %v3808_v33, %v3805_v53 }
  0xf1   : > { %v3822_v3 = vshll.u32 %v7382_v30, 16  ;;  %v3836_v50 = vshll.u32 %v7387_v7, 16  ;;  %v8085_v19 = vcombine.low %v7059_v0, %v7063_v2  ;;  %v3819_v22 = vor.u32 %v3818_v51, %v7384_v60 }
  0xf2   : > { %v3829_v4 = vrot.slane %v3827_v8, 4  ;;  %v3832_v54 = vrot.slane %v3830_v57, 5  ;;  %v8086_v31 = vcombine.low %v7075_v32, %v7080_v21  ;;  %v3738_v0 = vrot.slane %v3737_v45, 4  ;;  %v7414_v21 = vld [vmem:[%s6244_s22 + $0xa4] sm:$0x1] }
  0xf3   : > { %v3748_v2 = vrot.slane %v3747_v23, 4  ;;  %v3762_v47 = vrot.slane %v3761_v62, 4  ;;  %v3776_v42 = vrot.slane %v3774_v25, 5  ;;  %v3800_v63 = vrot.slane %v3798_v41, 5 }
  0xf4   : > { %v3851_v51 = vshrl.u32 %v5231_v37, 16  ;;  %v3854_v53 = vshll.u32 %v5231_v37, 16  ;;  %v3786_v33 = vrot.slane %v3785_v58, 4  ;;  %v3796_v8 = vrot.slane %v3795_v17, 4  ;;  %v7435_v58 = vld [vmem:[%s6244_s22 + $0xac] sm:$0xf] }
  0xf5   : > { %5737 = vmatmul.mubr.msk.bf16.vlgmr.msra.gmra.mrb[0].mxu0 %vm634_vm3, %v7110_v18  ;;  %v3840_v18 = vshrl.u32 %v7387_v7, 16  ;;  %v3810_v57 = vrot.slane %v3809_v29, 4  ;;  %v3820_v32 = vrot.slane %v3819_v22, 4  ;;  %v7416_v7 = vrot.slane %v3836_v50, 5  ;;  %v7454_v17 = vld [vmem:[%s6244_s22 + $0xb0] sm:$0x1] }
  0xf6   : > { %5583 = vmatmul.mubr.msk.bf16.gmra.mrb[16].mxu1 %vm634_vm3, %v8085_v19  ;;  %5769 = vmatpush3.bf16.msra.mxu0 %v7108_v20  ;;  %v3772_v20 = vrot.slane %v3771_v6, 4  ;;  %v3824_v19 = vrot.slane %v3822_v3, 5  ;;  %v3729_v6 = vsel %vm6271_vm4, %v7317_v1, %v7319_v39  ;;  %v8087_v45 = vrot.slane %v7322_v56, 5  ;;  %v5234_v29 = vld [vmem:[%s6244_s22 + $0xb4] sm:$0xf] }
  0xf7   : > { %5586 = vmatprep.mubr.msk.bf16.mxu1 %vm634_vm3, %v8086_v31  ;;  %5740 = vmatprep.mubr.msk.bf16.mxu0 %vm634_vm3, %v7295_v27  ;;  %v3833_v31 = vor.u32 %v3832_v54, %v3829_v4  ;;  %v3842_v27 = vrot.slane %v3840_v18, 4  ;;  %v3743_v62 = vsel %vm6271_vm4, %v3738_v0, %v7361_v13  ;;  %v3753_v25 = vsel %vm6271_vm4, %v3748_v2, %v3752_v59  ;;  %v7484_v54 = vld [vmem:[%s6244_s22 + $0xb8] sm:$0xf]  ;;  %v5280_v2 = vld [vmem:[%s6244_s22 + $0x48] sm:$0xe] }
  0xf8   : > { %v7427_v23 = vsel %vm6497_vm7, %v7334_v38, %v8087_v45  ;;  %v3767_v1 = vsel %vm6271_vm4, %v3762_v47, %v7374_v35  ;;  %v3777_v39 = vsel %vm6271_vm4, %v3772_v20, %v3776_v42  ;;  %v3853_v56 = vrot.slane %v3851_v51, 4  ;;  %v5281_v20 = vld [vmem:[%s6244_s22 + $0x54] sm:$0xe] }
  0xf9   : > { %v3856_v41 = vrot.slane %v3854_v53, 5  ;;  %v3791_v38 = vsel %vm6271_vm4, %v3786_v33, %v7379_v40  ;;  %v3801_v13 = vsel %vm6271_vm4, %v3796_v8, %v3800_v63  ;;  %v3815_v35 = vsel %vm6271_vm4, %v3810_v57, %v7384_v60 }
  0xfa   : > { %v3846_v59 = vshll.u32 %v7414_v21, 16  ;;  %v3825_v40 = vsel %vm6271_vm4, %v3820_v32, %v3824_v19  ;;  %v7465_v3 = vrot.slane %v3833_v31, 4  ;;  %v3843_v60 = vor.u32 %v3842_v27, %v7416_v7  ;;  %v8091_v19 = vld [vmem:[#allocation10_spill] sm:$0xff]  ;;  %v8092_v31 = vld [vmem:[#allocation12_spill] sm:$0xff] }
  0xfb   : > { %v3860_v50 = vshll.u32 %v7435_v58, 16  ;;  %v8089_v37 = vcombine.low %v7233_v48, %v7243_v26  ;;  %v7480_v22 = vcombine.low %v3743_v62, %v3753_v25  ;;  %v3864_v4 = vshrl.u32 %v7435_v58, 16 }
  0xfc   : > { %v7486_v18 = vcombine.low %v3767_v1, %v3777_v39  ;;  %v3857_v48 = vor.u32 %v3856_v41, %v3853_v56  ;;  %v3870_v26 = vshll.u32 %v7454_v17, 16  ;;  %v3875_v0 = vshrl.u32 %v5234_v29, 16  ;;  %v8093_v41 = vld [vmem:[#allocation11_spill] sm:$0xff] }
  0xfd   : > { %5741 = vmatmul.mubr.msk.bf16.gmra.mrb[4].mxu0 %vm634_vm3, %v7297_v14  ;;  %v8088_v14 = vcombine.low %v7141_v16, %v7159_v10  ;;  %v8090_v16 = vsel %vm6271_vm4, %v7283_v61, %v7220_v55  ;;  %v7490_v47 = vcombine.low %v3791_v38, %v3801_v13  ;;  %v7492_v55 = vcombine.low %v3815_v35, %v3825_v40  ;;  %v8095_v35 = vld [vmem:[#allocation13_spill] sm:$0xff] }
  0xfe   : > { %5744 = vmatprep.mubr.msk.bf16.mxu0 %vm634_vm3, %v7305_v5  ;;  %v5249_v10 = vcombine.low %v8090_v16, %v3729_v6  ;;  %v4904_v5 = vcombine.low %v7332_v12, %v7427_v23  ;;  %v3848_v61 = vrot.slane %v3846_v59, 5  ;;  %v3878_v42 = vshll.u32 %v5234_v29, 16  ;;  %v5282_v6 = vld [vmem:[%s6244_s22 + $0x60] sm:$0xe]  ;;  %v7546_v16 = vld [vmem:[%s6244_s22 + $0xbc] sm:$0x1] }
  0xff   : > { %5587 = vmatmul.mubr.msk.bf16.gmra.mrb[20].mxu1 %vm634_vm3, %v8088_v14  ;;  %v3839_v63 = vsel %vm6271_vm4, %v7465_v3, %v7416_v7  ;;  %v3844_v51 = vrot.slane %v3843_v60, 4  ;;  %v7499_v53 = vrot.slane %v3860_v50, 5  ;;  %v3884_v33 = vshll.u32 %v7484_v54, 16  ;;  %v8096_v14 = vld [vmem:[#allocation14_spill] sm:$0xff]  ;;  %v5283_v3 = vld [vmem:[%s6244_s22 + $0x6c] sm:$0xe] }
 0x100   : > { %5590 = vmatprep.mubr.msk.bf16.mxu1 %vm634_vm3, %v8089_v37  ;;  %v7502_v8 = vrot.slane %v3864_v4, 4  ;;  %v5296_v57 = vrot.slane %v5280_v2, 9  ;;  %v4337_v32 = vrot.slane %v8091_v19, 5  ;;  %v4340_v27 = vrot.slane %v8092_v31, 5  ;;  %v6115_v19 = vld [vmem:[%s6244_s22 + $0xc] sm:$0xff]  }
 0x101   : > { %v7507_v45 = vrot.slane %v3857_v48, 4  ;;  %v7509_v62 = vrot.slane %v3870_v26, 5  ;;  %v7511_v25 = vrot.slane %v3875_v0, 4  ;;  %v5297_v7 = vrot.slane %v5281_v20, 9  ;;  %v5237_v48 = vld [vmem:[%s6244_s22 + $0xc0] sm:$0xf] }
 0x102   : > { %v7515_v1 = vrot.slane %v3878_v42, 5  ;;  %v7519_v39 = vsel %vm6497_vm7, %v5296_v57, %v4337_v32  ;;  %v4339_v56 = vrot.slane %v4337_v32, 4  ;;  %v4344_v38 = vrot.slane %v8093_v41, 5  ;;  %v5284_v57 = vld [vmem:[%s6244_s22 + $0x78] sm:$0xe] }
 0x103   : > { %v8094_v13 = vcombine.low %v7250_v36, %v7257_v49  ;;  %v4347_v59 = vrot.slane %v8095_v35, 5  ;;  %v5298_v29 = vrot.slane %v5282_v6, 9  ;;  %v4351_v40 = vrot.slane %v8096_v14, 5  ;;  %v5285_v14 = vld [vmem:[%s6244_s22 + $0x84] sm:$0xe] }
 0x104   : > { %v8097_v60 = vcombine.low %v7264_v28, %v7272_v11  ;;  %v3849_v36 = vsel %vm6271_vm4, %v3844_v51, %v3848_v61  ;;  %v7539_v49 = vsel %vm6497_vm7, %v4339_v56, %v4340_v27  ;;  %v7543_v50 = vsel %vm6497_vm7, %v5297_v7, %v4344_v38  ;;  %v5013_v56 = vld [vmem:[%s6244_s22 + $0x78] sm:$0xf] }
 0x105   : > { %5745 = vmatmul.mubr.msk.bf16.gmra.mrb[8].mxu0 %vm634_vm3, %v7309_v24  ;;  %v3888_v24 = vshrl.u32 %v7484_v54, 16  ;;  %v4346_v37 = vrot.slane %v4344_v38, 4  ;;  %v5312_v28 = vcombine.low %v7519_v39, %v7539_v49  ;;  %v7552_v11 = vsel %vm6497_vm7, %v5298_v29, %v4351_v40 }
 0x106   : > { %5748 = vmatprep.mubr.msk.bf16.mxu0 %vm634_vm3, %v5249_v10  ;;  %v4353_v10 = vrot.slane %v4351_v40, 4  ;;  %v4354_v4 = vrot.slane %v7236_v46, 5  ;;  %v5299_v0 = vrot.slane %v5283_v3, 9  ;;  %v4358_v2 = vrot.slane %v7302_v52, 5  ;;  %v7576_v52 = vld [vmem:[%s6244_s22 + $0xc4] sm:$0xf] }
 0x107   : > { %5591 = vmatmul.mubr.msk.bf16.gmra.mrb[24].mxu1 %vm634_vm3, %v8094_v13  ;;  %v7558_v26 = vsel %vm6497_vm7, %v4346_v37, %v4347_v59  ;;  %v4361_v61 = vrot.slane %v7348_v9, 5  ;;  %v3867_v42 = vor.u32 %v7502_v8, %v7499_v53  ;;  %v7564_v20 = vrot.slane %v3884_v33, 5  ;;  %v8098_v13 = vld [vmem:[#allocation15_spill] sm:$0xff]  ;;  %v8100_v37 = vld [vmem:[#allocation5_spill] sm:$0xff] }
 0x108   : > { %5594 = vmatprep.mubr.msk.bf16.mxu1 %vm634_vm3, %v8097_v60  ;;  %v5313_v51 = vcombine.low %v7543_v50, %v7558_v26  ;;  %v7570_v46 = vsel %vm6497_vm7, %v4353_v10, %v4354_v4  ;;  %v3894_v32 = vshll.u32 %v7546_v16, 16  ;;  %v7582_v33 = vsel %vm6497_vm7, %v5299_v0, %v4358_v2  ;;  %v7624_v4 = vld [vmem:[%s6244_s22 + $0xc8] sm:$0x1]  ;;  %v6178_v26 = vld [vmem:[%s6244_s22 + $0x8c] sm:$0x1] }
 0x109   : > { %v5314_v9 = vcombine.low %v7552_v11, %v7570_v46  ;;  %v4360_v8 = vrot.slane %v4358_v2, 4  ;;  %v7584_v31 = vcombine.low %v3839_v63, %v3849_v36  ;;  %v3863_v27 = vsel %vm6271_vm4, %v7507_v45, %v7499_v53  ;;  %v8099_v36 = vld [vmem:[#allocation4_spill] sm:$0xff] }
 0x10a   : > { %v3881_v6 = vor.u32 %v7515_v1, %v7511_v25  ;;  %v3899_v7 = vshrl.u32 %v5237_v48, 16  ;;  %v7595_v41 = vrot.slane %v3888_v24, 4  ;;  %v5300_v38 = vrot.slane %v5284_v57, 9  ;;  %v6116_v57 = vld [vmem:[%s6244_s22 + $0x18] sm:$0xff]   ;;  %v7687_v53 = vld [vmem:[%s6244_s22 + $0xd4] sm:$0x1] }
 0x10b   : > { %v7599_v63 = vsel %vm6497_vm7, %v4360_v8, %v4361_v61  ;;  %v4365_v35 = vrot.slane %v8098_v13, 5  ;;  %v3902_v59 = vshll.u32 %v5237_v48, 16  ;;  %v3912_v24 = vshrl.u32 %v7576_v52, 16  ;;  %v5240_v8 = vld [vmem:[%s6244_s22 + $0xcc] sm:$0xf] }
 0x10c   : > { %v5315_v29 = vcombine.low %v7582_v33, %v7599_v63  ;;  %v3868_v40 = vrot.slane %v3867_v42, 4  ;;  %v3901_v3 = vrot.slane %v3899_v7, 4  ;;  %v2226_v60 = vshll.u32 %v5013_v56, 16  ;;  %v6181_v63 = vld [vmem:[%s6244_s22 + $0xac] sm:$0xf] }
 0x10d   : > { %5749 = vmatmul.mubr.msk.bf16.gmra.mrb[12].mxu0 %vm634_vm3, %v7480_v22  ;;  %v3908_v22 = vshll.u32 %v7576_v52, 16  ;;  %v7616_v12 = vsel %vm6497_vm7, %v5300_v38, %v4365_v35  ;;  %v4367_v23 = vrot.slane %v4365_v35, 4  ;;  %v2245_v10 = vsel %vm6271_vm4, %v8100_v37, %v8099_v36  ;;  %v6117_v38 = vld [vmem:[%s6244_s22 + $0x24] sm:$0xff]   ;;  %v7639_v35 = vld [vmem:[%s6244_s22 + $0xd0] sm:$0xf] }
 0x10e   : > { %5752 = vmatprep.mubr.msk.bf16.mxu0 %vm634_vm3, %v7486_v18  ;;  %v2223_v18 = vshrl.u32 %v5013_v56, 16  ;;  %v5301_v2 = vrot.slane %v5285_v14, 9  ;;  %v3904_v42 = vrot.slane %v3902_v59, 5  ;;  %v2228_v56 = vrot.slane %v2226_v60, 5  ;;  %v5286_v36 = vld [vmem:[%s6244_s22 + $0x90] sm:$0xe] }
 0x10f   : > { %5595 = vmatmul.mubr.msk.bf16.gmra.mrb[28].mxu1 %vm634_vm3, %v4904_v5  ;;  %v4368_v5 = vrot.slane %v7364_v43, 5  ;;  %v8101_v43 = vld [vmem:[#allocation16_spill] sm:$0xff]  ;;  %v3914_v13 = vrot.slane %v3912_v24, 4  ;;  %v3873_v59 = vsel %vm6271_vm4, %v3868_v40, %v7509_v62  ;;  %v3918_v24 = vshll.u32 %v7624_v4, 16  ;;  %v8102_v40 = vld [vmem:[#allocation2_spill] sm:$0xff] }
 0x110   : > { %5600 = vmatprep.mubr.msk.bf16.mxu1 %vm634_vm3, %v6115_v19  ;;  %v2225_v0 = vrot.slane %v2223_v18, 4  ;;  %v4372_v61 = vrot.slane %v8101_v43, 5  ;;  %v7632_v19 = vrot.slane %v3908_v22, 5  ;;  %v3891_v22 = vor.u32 %v7595_v41, %v7564_v20 }
 0x111   : > { %v7628_v48 = vsel %vm6497_vm7, %v4367_v23, %v4368_v5  ;;  %v4375_v5 = vrot.slane %v7377_v44, 5  ;;  %v3896_v18 = vrot.slane %v3894_v32, 5  ;;  %v3923_v37 = vshrl.u32 %v5240_v8, 16 }
 0x112   : > { %v5316_v7 = vcombine.low %v7616_v12, %v7628_v48  ;;  %v7643_v23 = vsel %vm6497_vm7, %v5301_v2, %v4372_v61  ;;  %v4374_v14 = vrot.slane %v4372_v61, 4  ;;  %v2229_v60 = vor.u32 %v2228_v56, %v2225_v0  ;;  %v6182_v48 = vld [vmem:[%s6244_s22 + $0xb8] sm:$0xf] }
 0x113   : > { %v3926_v2 = vshll.u32 %v5240_v8, 16  ;;  %v3932_v62 = vshll.u32 %v7639_v35, 16  ;;  %v3936_v32 = vshrl.u32 %v7639_v35, 16  ;;  %v3905_v0 = vor.u32 %v3904_v42, %v3901_v3 }
 0x114   : > { %v7657_v44 = vsel %vm6497_vm7, %v4374_v14, %v4375_v5  ;;  %v2230_v41 = vrot.slane %v2229_v60, 4  ;;  %v3915_v43 = vor.u32 %v3914_v13, %v7632_v19  ;;  %v5302_v61 = vrot.slane %v5286_v36, 9  ;;  %v8104_v14 = vld [vmem:[#allocation3_spill] sm:$0xff]  ;;  %v5287_v36 = vld [vmem:[%s6244_s22 + $0x9c] sm:$0xe] }
 0x115   : > { %5753 = vmatmul.mubr.msk.bf16.gmra.mrb[16].mxu0 %vm634_vm3, %v7490_v47  ;;  %v5317_v47 = vcombine.low %v7643_v23, %v7657_v44  ;;  %v5255_v8 = vcombine.low %v3863_v27, %v3873_v59  ;;  %v3882_v56 = vrot.slane %v3881_v6, 4  ;;  %v4382_v42 = vrot.slane %v7382_v30, 5  ;;  %v6119_v6 = vld [vmem:[%s6244_s22 + $0x3c] sm:$0xff]  }
 0x116   : > { %5756 = vmatprep.mubr.msk.bf16.mxu0 %vm634_vm3, %v7492_v55  ;;  %v8103_v55 = vld [vmem:[#allocation17_spill] sm:$0xff]  ;;  %v2235_v3 = vsel %vm6271_vm4, %v2230_v41, %v8104_v14  ;;  %v3925_v13 = vrot.slane %v3923_v37, 4  ;;  %v3928_v5 = vrot.slane %v3926_v2, 5  ;;  %v7689_v45 = vrot.slane %v3932_v62, 5 }
 0x117   : > { %5601 = vmatmul.mubr.msk.bf16.vlgmr.msra.gmra.mrb[0].mxu1 %vm634_vm3, %v6116_v57  ;;  %v4379_v57 = vrot.slane %v8103_v55, 5  ;;  %v7682_v60 = vcombine.low %v2235_v3, %v2245_v10  ;;  %v3938_v27 = vrot.slane %v3936_v32, 4  ;;  %v3906_v59 = vrot.slane %v3905_v0, 4  ;;  %v8105_v0 = vld [vmem:[#allocation18_spill] sm:$0xff]  ;;  %v6169_v55 = vld [vmem:[%s6244_s22 + $0x1c] sm:$0xf] }
 0x118   : > { %5803 = vmatpush3.bf16.msra.mxu1 %v8102_v40  ;;  %5604 = vmatprep.mubr.msk.bf16.mxu1 %vm634_vm3, %v6117_v38  ;;  %v3892_v38 = vrot.slane %v3891_v22, 4  ;;  %v6118_v40 = vld [vmem:[%s6244_s22 + $0x30] sm:$0xff]   ;;  %v3916_v30 = vrot.slane %v3915_v43, 4  ;;  %v3920_v22 = vrot.slane %v3918_v24, 5  ;;  %v5303_v37 = vrot.slane %v5287_v36, 9 }
 0x119   : > { %v7693_v25 = vsel %vm6497_vm7, %v5302_v61, %v4379_v57  ;;  %v4381_v1 = vrot.slane %v4379_v57, 4  ;;  %v3887_v2 = vsel %vm6271_vm4, %v3882_v56, %v7564_v20  ;;  %v3942_v62 = vshll.u32 %v7687_v53, 16 }
 0x11a   : > { %v3897_v24 = vsel %vm6271_vm4, %v3892_v38, %v3896_v18  ;;  %v3939_v41 = vor.u32 %v3938_v27, %v7689_v45  ;;  %v4386_v43 = vrot.slane %v8105_v0, 5  ;;  %v3911_v20 = vsel %vm6271_vm4, %v3906_v59, %v7632_v19  ;;  %v5288_v38 = vld [vmem:[%s6244_s22 + $0xa8] sm:$0xe]  ;;  %v6121_v27 = vld [vmem:[%s6244_s22 + $0x54] sm:$0xff]  }
 0x11b   : > { %v7698_v10 = vsel %vm6497_vm7, %v4381_v1, %v4382_v42  ;;  %v3921_v61 = vsel %vm6271_vm4, %v3916_v30, %v3920_v22  ;;  %v4309_v57 = vrot.slane %v6169_v55, 5  ;;  %v4389_v18 = vrot.slane %v7414_v21, 5  ;;  %v6120_v19 = vld [vmem:[%s6244_s22 + $0x48] sm:$0xff]  }
 0x11c   : > { %v5318_v32 = vcombine.low %v7693_v25, %v7698_v10  ;;  %v7725_v56 = vsel %vm6497_vm7, %v5303_v37, %v4386_v43  ;;  %v4388_v14 = vrot.slane %v4386_v43, 4  ;;  %v5256_v3 = vcombine.low %v3887_v2, %v3897_v24  ;;  %v6171_v2 = vld [vmem:[%s6244_s22 + $0x28] sm:$0xf] }
 0x11d   : > { %5757 = vmatmul.mubr.msk.bf16.gmra.mrb[20].mxu0 %vm634_vm3, %v7584_v31  ;;  %v3929_v31 = vor.u32 %v3928_v5, %v3925_v13  ;;  %v3944_v42 = vrot.slane %v3942_v62, 5  ;;  %v5257_v13 = vcombine.low %v3911_v20, %v3921_v61  ;;  %v3940_v36 = vrot.slane %v3939_v41, 4  ;;  %v8106_v61 = vld [vmem:[#allocation6_spill] sm:$0xff] }
 0x11e   : > { %5760 = vmatprep.mubr.msk.bf16.mxu0 %vm634_vm3, %v5255_v8  ;;  %v5276_v8 = vld [vmem:[%s6244_s22 + $0x18] sm:$0xe]  ;;  %v4311_v1 = vrot.slane %v4309_v57, 4  ;;  %v5304_v22 = vrot.slane %v5288_v38, 9  ;;  %v4393_v37 = vrot.slane %v7435_v58, 5  ;;  %v4316_v62 = vrot.slane %v6171_v2, 5 }
 0x11f   : > { %5605 = vmatmul.mubr.msk.bf16.gmra.mrb[4].mxu1 %vm634_vm3, %v6118_v40  ;;  %v3930_v5 = vrot.slane %v3929_v31, 4  ;;  %v7731_v40 = vsel %vm6497_vm7, %v4388_v14, %v4389_v18  ;;  %v5292_v21 = vrot.slane %v5276_v8, 9  ;;  %v4396_v24 = vrot.slane %v7454_v17, 5  ;;  %v5277_v58 = vld [vmem:[%s6244_s22 + $0x24] sm:$0xe] }
 0x120   : > { %5608 = vmatprep.mubr.msk.bf16.mxu1 %vm634_vm3, %v6119_v6  ;;  %v6170_v6 = vld [vmem:[%s6244_s22 + $0x20] sm:$0x1]  ;;  %v5319_v30 = vcombine.low %v7725_v56, %v7731_v40  ;;  %v3945_v41 = vsel %vm6271_vm4, %v3940_v36, %v3944_v42  ;;  %v7751_v0 = vsel %vm6497_vm7, %v5304_v22, %v4393_v37  ;;  %v4395_v43 = vrot.slane %v4393_v37, 4  ;;  %v5289_v17 = vld [vmem:[%s6244_s22 + $0xb4] sm:$0xe] }
 0x121   : > { %v4312_v59 = vrot.slane %v6170_v6, 5  ;;  %v3935_v31 = vsel %vm6271_vm4, %v3930_v5, %v7689_v45  ;;  %v4310_v20 = vsel %vm6497_vm7, %v5292_v21, %v4309_v57  ;;  %v4323_v55 = vrot.slane %v8106_v61, 5  ;;  %v5278_v18 = vld [vmem:[%s6244_s22 + $0x30] sm:$0xe]  ;;  %v6172_v5 = vld [vmem:[%s6244_s22 + $0x2c] sm:$0x1] }
 0x122   : > { %v7763_v8 = vsel %vm6497_vm7, %v4395_v43, %v4396_v24  ;;  %v5258_v14 = vcombine.low %v3935_v31, %v3945_v41  ;;  %v5305_v38 = vrot.slane %v5289_v17, 9  ;;  %v4319_v36 = vrot.slane %v6172_v5, 5  ;;  %v6123_v21 = vld [vmem:[%s6244_s22 + $0x6c] sm:$0xff]   ;;  %v5279_v31 = vld [vmem:[%s6244_s22 + $0x3c] sm:$0xe] }
 0x123   : > { %v4313_v45 = vsel %vm6497_vm7, %v4311_v1, %v4312_v59  ;;  %v5320_v42 = vcombine.low %v7751_v0, %v7763_v8  ;;  %v5294_v1 = vrot.slane %v5278_v18, 9  ;;  %v4325_v6 = vrot.slane %v4323_v55, 4  ;;  %v8107_v59 = vld [vmem:[#allocation7_spill] sm:$0xff]  ;;  %v8108_v41 = vld [vmem:[#allocation8_spill] sm:$0xff]  ;;  %v5290_v43 = vld [vmem:[%s6244_s22 + $0xc0] sm:$0xe] }
 0x124   : > { %v5308_v57 = vcombine.low %v4310_v20, %v4313_v45  ;;  %v4326_v22 = vrot.slane %v8107_v59, 5  ;;  %v4403_v37 = vrot.slane %v7546_v16, 5  ;;  %v5295_v61 = vrot.slane %v5279_v31, 9  ;;  %v6124_v5 = vld [vmem:[%s6244_s22 + $0x78] sm:$0xff]   ;;  %v6186_v56 = vld [vmem:[%s6244_s22 + $0xc8] sm:$0x1] }
 0x125   : > { %5761 = vmatmul.mubr.msk.bf16.gmra.mrb[24].mxu0 %vm634_vm3, %v5256_v3  ;;  %v5293_v3 = vrot.slane %v5277_v58, 9  ;;  %v4330_v58 = vrot.slane %v8108_v41, 5  ;;  %v4324_v20 = vsel %vm6497_vm7, %v5294_v1, %v4323_v55  ;;  %v5306_v18 = vrot.slane %v5290_v43, 9  ;;  %v5010_v55 = vld [vmem:[%s6244_s22 + $0x6c] sm:$0xf] }
 0x126   : > { %5764 = vmatprep.mubr.msk.bf16.mxu0 %vm634_vm3, %v5257_v13  ;;  %v4318_v13 = vrot.slane %v4316_v62, 4  ;;  %v4327_v45 = vsel %vm6497_vm7, %v4325_v6, %v4326_v22  ;;  %v5291_v1 = vld [vmem:[%s6244_s22 + $0xcc] sm:$0xe]  ;;  %v6125_v6 = vld [vmem:[%s6244_s22 + $0x84] sm:$0xff]   ;;  %v2199_v22 = vshrl.u32 %v5010_v55, 16  ;;  %v2202_v31 = vshll.u32 %v5010_v55, 16 }
 0x127   : > { %5609 = vmatmul.mubr.msk.bf16.gmra.mrb[8].mxu1 %vm634_vm3, %v6120_v19  ;;  %v6122_v19 = vld [vmem:[%s6244_s22 + $0x60] sm:$0xff]   ;;  %v6173_v41 = vld [vmem:[%s6244_s22 + $0x70] sm:$0xf]  ;;  %v2386_v40 = vshll.u32 %v6186_v56, 16 }
 0x128   : > { %5612 = vmatprep.mubr.msk.bf16.mxu1 %vm634_vm3, %v6121_v27  ;;  %v4400_v27 = vrot.slane %v7484_v54, 5  ;;  %v4317_v54 = vsel %vm6497_vm7, %v5293_v3, %v4316_v62  ;;  %v4320_v16 = vsel %vm6497_vm7, %v4318_v13, %v4319_v36  ;;  %v4410_v13 = vrot.slane %v7624_v4, 5 }
 0x129   : > { %v5309_v3 = vcombine.low %v4317_v54, %v4320_v16  ;;  %v5310_v36 = vcombine.low %v4324_v20, %v4327_v45  ;;  %v2212_v43 = vshrl.u32 %v6173_v41, 16  ;;  %v4414_v54 = vrot.slane %v7639_v35, 5 }
 0x12a   : > { %v7775_v2 = vsel %vm6497_vm7, %v5305_v38, %v4400_v27  ;;  %v4402_v24 = vrot.slane %v4400_v27, 4  ;;  %v4332_v38 = vrot.slane %v4330_v58, 4  ;;  %v4417_v16 = vrot.slane %v7687_v53, 5 }
 0x12b   : > { %v4416_v45 = vrot.slane %v4414_v54, 4 }
 0x12c   : > { %v7789_v17 = vsel %vm6497_vm7, %v4402_v24, %v4403_v37  ;;  %v5307_v24 = vrot.slane %v5291_v1, 9 }
 0x12d   : > { %5765 = vmatmul.mubr.msk.bf16.gmra.mrb[28].mxu0 %vm634_vm3, %v5258_v14  ;;  %v5321_v62 = vcombine.low %v7775_v2, %v7789_v17  ;;  %v4407_v14 = vrot.slane %v7576_v52, 5  ;;  %v4331_v52 = vsel %vm6497_vm7, %v5295_v61, %v4330_v58  ;;  %v2208_v58 = vshll.u32 %v6173_v41, 16 }
 0x12e   : > { %5770 = vmatprep.mubr.msk.bf16.mxu0 %vm634_vm3, %v5308_v57  ;;  %v7828_v20 = vsel %vm6497_vm7, %v5307_v24, %v4414_v54  ;;  %v7833_v35 = vsel %vm6497_vm7, %v4416_v45, %v4417_v16  ;;  %v6128_v24 = vld [vmem:[%s6244_s22 + $0xa8] sm:$0xff]  }
 0x12f   : > { %5613 = vmatmul.mubr.msk.bf16.gmra.mrb[12].mxu1 %vm634_vm3, %v6122_v19  ;;  %v8109_v19 = vld [vmem:[#allocation9_spill] sm:$0xff]  ;;  %v7805_v27 = vsel %vm6497_vm7, %v5306_v18, %v4407_v14  ;;  %v2201_v18 = vrot.slane %v2199_v22, 4  ;;  %v5323_v53 = vcombine.low %v7828_v20, %v7833_v35  ;;  %v5019_v22 = vld [vmem:[%s6244_s22 + $0x90] sm:$0xf] }
 0x130   : > { %5616 = vmatprep.mubr.msk.bf16.mxu1 %vm634_vm3, %v6123_v21  ;;  %v4333_v57 = vrot.slane %v8109_v19, 5  ;;  %v4409_v21 = vrot.slane %v4407_v14, 4  ;;  %v6126_v14 = vld [vmem:[%s6244_s22 + $0x90] sm:$0xff]   ;;  %v2214_v19 = vrot.slane %v2212_v43, 4  ;;  %v2271_v45 = vshrl.u32 %v5019_v22, 16 }
 0x131   : > { %v6129_v43 = vld [vmem:[%s6244_s22 + $0xb4] sm:$0xff]  }
 0x132   : > { %v7813_v59 = vsel %vm6497_vm7, %v4409_v21, %v4410_v13  ;;  %v4334_v4 = vsel %vm6497_vm7, %v4332_v38, %v4333_v57  ;;  %v2210_v38 = vrot.slane %v2208_v58, 5  ;;  %v6127_v57 = vld [vmem:[%s6244_s22 + $0x9c] sm:$0xff]   ;;  %v5016_v13 = vld [vmem:[%s6244_s22 + $0x84] sm:$0xf] }
 0x133   : > { %v5322_v37 = vcombine.low %v7805_v27, %v7813_v59  ;;  %v5311_v61 = vcombine.low %v4331_v52, %v4334_v4  ;;  %v2247_v21 = vshrl.u32 %v5016_v13, 16  ;;  %v2250_v1 = vshll.u32 %v5016_v13, 16  ;;  %v5022_v58 = vld [vmem:[%s6244_s22 + $0x9c] sm:$0xf]  ;;  %v6177_v13 = vld [vmem:[%s6244_s22 + $0xa0] sm:$0xf] }
 0x134   : > { %v2215_v55 = vor.u32 %v2214_v19, %v2210_v38  ;;  %v2295_v19 = vshrl.u32 %v5022_v58, 16 }
 0x135   : > { %5771 = vmatmul.mubr.msk.bf16.vlgmr.msra.gmra.mrb[0].mxu0 %vm634_vm3, %v5309_v3  ;;  %v2204_v3 = vrot.slane %v2202_v31, 5  ;;  %v2249_v49 = vrot.slane %v2247_v21, 4 }
 0x136   : > { %5774 = vmatprep.mubr.msk.bf16.mxu0 %vm634_vm3, %v5310_v36  ;;  %v2216_v39 = vrot.slane %v2215_v55, 4 }
 0x137   : > { %5617 = vmatmul.mubr.msk.bf16.gmra.mrb[16].mxu1 %vm634_vm3, %v6124_v5  ;;  %v6174_v5 = vld [vmem:[%s6244_s22 + $0x74] sm:$0x1]  ;;  %v2205_v15 = vor.u32 %v2204_v3, %v2201_v18 }
 0x138   : > { %5620 = vmatprep.mubr.msk.bf16.mxu1 %vm634_vm3, %v6125_v6  ;;  %v2218_v36 = vshll.u32 %v6174_v5, 16  ;;  %v6175_v6 = vld [vmem:[%s6244_s22 + $0x88] sm:$0xf]  ;;  %v6176_v18 = vld [vmem:[%s6244_s22 + $0x94] sm:$0xf]  ;;  %v2304_v5 = vshll.u32 %v6177_v13, 16 }
 0x139   : > { %v2256_v52 = vshll.u32 %v6175_v6, 16  ;;  %v2260_v4 = vshrl.u32 %v6175_v6, 16  ;;  %v2206_v41 = vrot.slane %v2205_v15, 4  ;;  %v2284_v3 = vshrl.u32 %v6176_v18, 16 }
 0x13a   : > { %v2220_v31 = vrot.slane %v2218_v36, 5  ;;  %v2308_v36 = vshrl.u32 %v6177_v13, 16  ;;  %v2297_v6 = vrot.slane %v2295_v19, 4 }
 0x13b   : > { %v7852_v54 = vrot.slane %v2256_v52, 5  ;;  %v2262_v16 = vrot.slane %v2260_v4, 4  ;;  %v2211_v15 = vsel %vm6271_vm4, %v2206_v41, %v2210_v38  ;;  %v7874_v38 = vrot.slane %v2304_v5, 5 }
 0x13c   : > { %v2221_v50 = vsel %vm6271_vm4, %v2216_v39, %v2220_v31  ;;  %v2310_v4 = vrot.slane %v2308_v36, 4 }
 0x13d   : > { %5775 = vmatmul.mubr.msk.bf16.gmra.mrb[4].mxu0 %vm634_vm3, %v5311_v61  ;;  %v2274_v61 = vshll.u32 %v5019_v22, 16  ;;  %v2263_v21 = vor.u32 %v2262_v16, %v7852_v54  ;;  %v6130_v22 = vld [vmem:[%s6244_s22 + $0xc0] sm:$0xff]  }
 0x13e   : > { %5778 = vmatprep.mubr.msk.bf16.mxu0 %vm634_vm3, %v5312_v28  ;;  %v2252_v28 = vrot.slane %v2250_v1, 5  ;;  %v2273_v1 = vrot.slane %v2271_v45, 4 }
 0x13f   : > { %5621 = vmatmul.mubr.msk.bf16.gmra.mrb[20].mxu1 %vm634_vm3, %v6126_v14  ;;  %v2280_v14 = vshll.u32 %v6176_v18, 16  ;;  %v2276_v11 = vrot.slane %v2274_v61, 5  ;;  %v2264_v39 = vrot.slane %v2263_v21, 4  ;;  %v2311_v61 = vor.u32 %v2310_v4, %v7874_v38  ;;  %v6180_v18 = vld [vmem:[%s6244_s22 + $0xa4] sm:$0x1] }
 0x140   : > { %5624 = vmatprep.mubr.msk.bf16.mxu1 %vm634_vm3, %v6127_v57  ;;  %v2298_v57 = vshll.u32 %v5022_v58, 16  ;;  %v2253_v55 = vor.u32 %v2252_v28, %v2249_v49  ;;  %v6179_v28 = vld [vmem:[%s6244_s22 + $0x98] sm:$0x1] }
 0x141   : > { %v7872_v46 = vrot.slane %v2280_v14, 5  ;;  %v2277_v49 = vor.u32 %v2276_v11, %v2273_v1  ;;  %v2290_v58 = vshll.u32 %v6179_v28, 16  ;;  %v2314_v14 = vshll.u32 %v6180_v18, 16 }
 0x142   : > { %v2300_v52 = vrot.slane %v2298_v57, 5  ;;  %v2254_v41 = vrot.slane %v2253_v55, 4  ;;  %v2332_v57 = vshrl.u32 %v6181_v63, 16  ;;  %v2312_v21 = vrot.slane %v2311_v61, 4 }
 0x143   : > { %v2278_v36 = vrot.slane %v2277_v49, 4  ;;  %v2316_v1 = vrot.slane %v2314_v14, 5  ;;  %v6185_v14 = vld [vmem:[%s6244_s22 + $0xbc] sm:$0x1] }
 0x144   : > { %v2301_v45 = vor.u32 %v2300_v52, %v2297_v6  ;;  %v2259_v13 = vsel %vm6271_vm4, %v2254_v41, %v7852_v54  ;;  %v2334_v52 = vrot.slane %v2332_v57, 4  ;;  %v5031_v41 = vld [vmem:[%s6244_s22 + $0xc0] sm:$0xf]  ;;  %v2362_v25 = vshll.u32 %v6185_v14, 16 }
 0x145   : > { %5779 = vmatmul.mubr.msk.bf16.gmra.mrb[8].mxu0 %vm634_vm3, %v5313_v51  ;;  %v2266_v51 = vshll.u32 %v6178_v26, 16  ;;  %v2356_v26 = vshrl.u32 %v6182_v48, 16  ;;  %v2317_v23 = vsel %vm6271_vm4, %v2312_v21, %v2316_v1 }
 0x146   : > { %5782 = vmatprep.mubr.msk.bf16.mxu0 %vm634_vm3, %v5314_v9  ;;  %v2286_v9 = vrot.slane %v2284_v3, 4  ;;  %v5028_v3 = vld [vmem:[%s6244_s22 + $0xb4] sm:$0xf]  ;;  %v2302_v55 = vrot.slane %v2301_v45, 4 }
 0x147   : > { %5625 = vmatmul.mubr.msk.bf16.gmra.mrb[24].mxu1 %vm634_vm3, %v6128_v24  ;;  %v5042_v24 = vcombine.low %v2211_v15, %v2221_v50  ;;  %v2268_v31 = vrot.slane %v2266_v51, 5  ;;  %v2292_v15 = vrot.slane %v2290_v58, 5  ;;  %v2343_v50 = vshrl.u32 %v5028_v3, 16 }
 0x148   : > { %5628 = vmatprep.mubr.msk.bf16.mxu1 %vm634_vm3, %v6129_v43  ;;  %v5025_v43 = vld [vmem:[%s6244_s22 + $0xa8] sm:$0xf]  ;;  %v2287_v16 = vor.u32 %v2286_v9, %v7872_v46  ;;  %v2346_v12 = vshll.u32 %v5028_v3, 16  ;;  %v2307_v28 = vsel %vm6271_vm4, %v2302_v55, %v7874_v38  ;;  %v2370_v38 = vshll.u32 %v5031_v41, 16 }
 0x149   : > { %v2319_v19 = vshrl.u32 %v5025_v43, 16  ;;  %v2322_v33 = vshll.u32 %v5025_v43, 16  ;;  %v2269_v5 = vsel %vm6271_vm4, %v2264_v39, %v2268_v31  ;;  %v2345_v4 = vrot.slane %v2343_v50, 4 }
 0x14a   : > { %v2288_v51 = vrot.slane %v2287_v16, 4  ;;  %v5044_v54 = vcombine.low %v2259_v13, %v2269_v5  ;;  %v2358_v31 = vrot.slane %v2356_v26, 4  ;;  %v2283_v39 = vsel %vm6271_vm4, %v2278_v36, %v7872_v46  ;;  %v6183_v46 = vld [vmem:[%s6244_s22 + $0xb0] sm:$0x1]  ;;  %v6184_v16 = vld [vmem:[%s6244_s22 + $0xc4] sm:$0xf] }
 0x14b   : > { %v2321_v11 = vrot.slane %v2319_v19, 4  ;;  %v2324_v9 = vrot.slane %v2322_v33, 5  ;;  %v2338_v58 = vshll.u32 %v6183_v46, 16  ;;  %v2367_v43 = vshrl.u32 %v5031_v41, 16 }
 0x14c   : > { %v2293_v49 = vsel %vm6271_vm4, %v2288_v51, %v2292_v15  ;;  %v2376_v45 = vshll.u32 %v6184_v16, 16  ;;  %v2380_v61 = vshrl.u32 %v6184_v16, 16  ;;  %v2364_v15 = vrot.slane %v2362_v25, 5 }
 0x14d   : > { %5783 = vmatmul.mubr.msk.bf16.gmra.mrb[12].mxu0 %vm634_vm3, %v5315_v29  ;;  %v2328_v29 = vshll.u32 %v6181_v63, 16  ;;  %v2325_v44 = vor.u32 %v2324_v9, %v2321_v11  ;;  %v5045_v10 = vcombine.low %v2283_v39, %v2293_v49  ;;  %v2340_v33 = vrot.slane %v2338_v58, 5 }
 0x14e   : > { %5786 = vmatprep.mubr.msk.bf16.mxu0 %vm634_vm3, %v5316_v7  ;;  %v2352_v7 = vshll.u32 %v6182_v48, 16  ;;  %v2369_v63 = vrot.slane %v2367_v43, 4  ;;  %v2378_v57 = vrot.slane %v2376_v45, 5  ;;  %v2382_v13 = vrot.slane %v2380_v61, 4 }
 0x14f   : > { %5629 = vmatmul.mubr.msk.bf16.gmra.mrb[28].mxu1 %vm634_vm3, %v6130_v22  ;;  %v2330_v6 = vrot.slane %v2328_v29, 5  ;;  %v2348_v22 = vrot.slane %v2346_v12, 5  ;;  %v2326_v3 = vrot.slane %v2325_v44, 4  ;;  %v2372_v29 = vrot.slane %v2370_v38, 5 }
 0x150   : > { %5650 = vmatprep.mubr.msk.bf16.mxu1 %vm634_vm3, %v5042_v24  ;;  %v2354_v24 = vrot.slane %v2352_v7, 5  ;;  %v2383_v7 = vor.u32 %v2382_v13, %v2378_v57  ;;  %v2388_v55 = vrot.slane %v2386_v40, 5 }
 0x151   : > { %v2331_v50 = vsel %vm6271_vm4, %v2326_v3, %v2330_v6  ;;  %v2373_v48 = vor.u32 %v2372_v29, %v2369_v63 }
 0x152   : > { %v2359_v18 = vor.u32 %v2358_v31, %v2354_v24  ;;  %v2384_v51 = vrot.slane %v2383_v7, 4 }
 0x153   : > { %v2374_v26 = vrot.slane %v2373_v48, 4 }
 0x154   : > { %v2360_v36 = vrot.slane %v2359_v18, 4  ;;  %v2389_v1 = vsel %vm6271_vm4, %v2384_v51, %v2388_v55 }
 0x155   : > { %5787 = vmatmul.mubr.msk.bf16.gmra.mrb[16].mxu0 %vm634_vm3, %v5317_v47  ;;  %v2335_v47 = vor.u32 %v2334_v52, %v2330_v6  ;;  %v2379_v21 = vsel %vm6271_vm4, %v2374_v26, %v2378_v57 }
 0x156   : > { %5790 = vmatprep.mubr.msk.bf16.mxu0 %vm634_vm3, %v5318_v32  ;;  %v5046_v32 = vcombine.low %v2307_v28, %v2317_v23  ;;  %v2365_v0 = vsel %vm6271_vm4, %v2360_v36, %v2364_v15  ;;  %v5049_v11 = vcombine.low %v2379_v21, %v2389_v1 }
 0x157   : > { %5651 = vmatmul.mubr.msk.bf16.vlgmr.msra.gmra.mrb[16].mxu1 %vm634_vm3, %v7682_v60  ;;  %v2349_v60 = vor.u32 %v2348_v22, %v2345_v4  ;;  %v2336_v19 = vrot.slane %v2335_v47, 4 }
 0x158   : > { %5654 = vmatprep.mubr.msk.bf16.mxu1 %vm634_vm3, %v5044_v54 }
 0x159   : > { %v2350_v5 = vrot.slane %v2349_v60, 4  ;;  %v2341_v12 = vsel %vm6271_vm4, %v2336_v19, %v2340_v33 }
 0x15a   : > { %v5047_v8 = vcombine.low %v2331_v50, %v2341_v12 }
 0x15d   : > { %5791 = vmatmul.mubr.msk.bf16.gmra.mrb[20].mxu0 %vm634_vm3, %v5319_v30  ;;  %v2355_v30 = vsel %vm6271_vm4, %v2350_v5, %v2354_v24 }
 0x15e   : > { %5794 = vmatprep.mubr.msk.bf16.mxu0 %vm634_vm3, %v5320_v42  ;;  %v5048_v42 = vcombine.low %v2355_v30, %v2365_v0 }
 0x15f   : > { %5655 = vmatmul.mubr.msk.bf16.gmra.mrb[20].mxu1 %vm634_vm3, %v5045_v10 }
 0x160   : > { %5658 = vmatprep.mubr.msk.bf16.mxu1 %vm634_vm3, %v5046_v32 }
 0x165   : > { %5795 = vmatmul.mubr.msk.bf16.gmra.mrb[24].mxu0 %vm634_vm3, %v5321_v62 }
 0x166   : > { %5798 = vmatprep.mubr.msk.bf16.mxu0 %vm634_vm3, %v5322_v37 }
 0x167   : > { %5659 = vmatmul.mubr.msk.bf16.gmra.mrb[24].mxu1 %vm634_vm3, %v5047_v8 }
 0x168   : > { %5662 = vmatprep.mubr.msk.bf16.mxu1 %vm634_vm3, %v5048_v42 }
 0x16d   : > { %5799 = vmatmul.mubr.msk.bf16.gmra.mrb[28].mxu0 %vm634_vm3, %v5323_v53 }
 0x16f   : > { %5663 = vmatmul.mubr.msk.bf16.gmra.mrb[28].mxu1 %vm634_vm3, %v5049_v11 }
 0x1ea   : > { %v5602_v2 = vpop.f32.mrb[0].mxu1 }
 0x1eb   : > { %v1799_v17 = vpop.f32.mrb[1].mxu1 }
 0x1ec   : > { %v5603_v62 = vpop.f32.mrb[2].mxu1 }
 0x1ed   : > { %v1802_v27 = vpop.f32.mrb[3].mxu1 }
 0x1f2   : > { %v5606_v59 = vpop.f32.mrb[4].mxu1 }
 0x1f3   : > { %v1815_v37 = vpop.f32.mrb[5].mxu1 }
 0x1f4   : > { %v5607_v9 = vpop.f32.mrb[6].mxu1 }
 0x1f5   : > { %v1818_v6 = vpop.f32.mrb[7].mxu1 }
 0x1fa   : > { %v5610_v52 = vpop.f32.mrb[8].mxu1 }
 0x1fb   : > { %v1831_v34 = vpop.f32.mrb[9].mxu1 }
 0x1fc   : > { %v5611_v54 = vpop.f32.mrb[10].mxu1 }
 0x1fd   : > { %v1834_v4 = vpop.f32.mrb[11].mxu1 }
 0x202   : > { %v5614_v22 = vpop.f32.mrb[12].mxu1 }
 0x203   : > { %v1847_v24 = vpop.f32.mrb[13].mxu1 }
 0x204   : > { %v5615_v20 = vpop.f32.mrb[14].mxu1 }
 0x205   : > { %v1850_v35 = vpop.f32.mrb[15].mxu1 }
 0x208   : > { %v5772_v53 = vpop.f32.mrb[0].mxu0 }
 0x209   : > { %v5804_v31 = vadd.f32 %v5772_v53, %v5602_v2  ;;  %v4553_v41 = vpop.f32.mrb[1].mxu0 }
 0x20a   : > { %v5805_v39 = vadd.f32 %v4553_v41, %v1799_v17  ;;  %v5773_v49 = vpop.f32.mrb[2].mxu0 }
 0x20b   : > { %4715 = vst.msk [vmem:[%s7967_s14 + $0x10] sm:$0xff] %vm4712_vm8, %v5804_v31  ;;  %v5806_v28 = vadd.f32 %v5773_v49, %v5603_v62  ;;  %v4556_v23 = vpop.f32.mrb[3].mxu0 }
 0x20c   : > { %4713 = vst.msk [vmem:[%s7967_s14] sm:$0xff] %vm4712_vm8, %v5805_v39  ;;  %v5807_v44 = vadd.f32 %v4556_v23, %v1802_v27 }
 0x20d   : > { %4716 = vst.msk [vmem:[%s7967_s14 + $0x18] sm:$0xff] %vm4712_vm8, %v5806_v28 }
 0x20e   : > { %4714 = vst.msk [vmem:[%s7967_s14 + $0x8] sm:$0xff] %vm4712_vm8, %v5807_v44 }
 0x210   : > { %v5776_v47 = vpop.f32.mrb[4].mxu0 }
 0x211   : > { %v5808_v46 = vadd.f32 %v5776_v47, %v5606_v59  ;;  %v4569_v58 = vpop.f32.mrb[5].mxu0 }
 0x212   : > { %v5809_v43 = vadd.f32 %v4569_v58, %v1815_v37  ;;  %v5777_v38 = vpop.f32.mrb[6].mxu0 }
 0x213   : > { %4719 = vst.msk [vmem:[%s7967_s14 + $0x30] sm:$0xff] %vm4712_vm8, %v5808_v46  ;;  %v5810_v16 = vadd.f32 %v5777_v38, %v5607_v9  ;;  %v4572_v45 = vpop.f32.mrb[7].mxu0 }
 0x214   : > { %4717 = vst.msk [vmem:[%s7967_s14 + $0x20] sm:$0xff] %vm4712_vm8, %v5809_v43  ;;  %v5811_v61 = vadd.f32 %v4572_v45, %v1818_v6 }
 0x215   : > { %4720 = vst.msk [vmem:[%s7967_s14 + $0x38] sm:$0xff] %vm4712_vm8, %v5810_v16 }
 0x216   : > { %4718 = vst.msk [vmem:[%s7967_s14 + $0x28] sm:$0xff] %vm4712_vm8, %v5811_v61 }
 0x218   : > { %v5780_v60 = vpop.f32.mrb[8].mxu0 }
 0x219   : > { %v5812_v18 = vadd.f32 %v5780_v60, %v5610_v52  ;;  %v4585_v14 = vpop.f32.mrb[9].mxu0 }
 0x21a   : > { %v5813_v25 = vadd.f32 %v4585_v14, %v1831_v34  ;;  %v5781_v10 = vpop.f32.mrb[10].mxu0 }
 0x21b   : > { %4723 = vst.msk [vmem:[%s7967_s14 + $0x50] sm:$0xff] %vm4712_vm8, %v5812_v18  ;;  %v5814_v32 = vadd.f32 %v5781_v10, %v5611_v54  ;;  %v4588_v3 = vpop.f32.mrb[11].mxu0 }
 0x21c   : > { %4721 = vst.msk [vmem:[%s7967_s14 + $0x40] sm:$0xff] %vm4712_vm8, %v5813_v25  ;;  %v5815_v19 = vadd.f32 %v4588_v3, %v1834_v4 }
 0x21d   : > { %4724 = vst.msk [vmem:[%s7967_s14 + $0x58] sm:$0xff] %vm4712_vm8, %v5814_v32 }
 0x21e   : > { %4722 = vst.msk [vmem:[%s7967_s14 + $0x48] sm:$0xff] %vm4712_vm8, %v5815_v19 }
 0x220   : > { %v5784_v33 = vpop.f32.mrb[12].mxu0 }
 0x221   : > { %v5816_v63 = vadd.f32 %v5784_v33, %v5614_v22  ;;  %v4601_v29 = vpop.f32.mrb[13].mxu0 }
 0x222   : > { %v5817_v57 = vadd.f32 %v4601_v29, %v1847_v24  ;;  %v5785_v13 = vpop.f32.mrb[14].mxu0 }
 0x223   : > { %4727 = vst.msk [vmem:[%s7967_s14 + $0x70] sm:$0xff] %vm4712_vm8, %v5816_v63  ;;  %v5818_v5 = vadd.f32 %v5785_v13, %v5615_v20  ;;  %v4604_v36 = vpop.f32.mrb[15].mxu0 }
 0x224   : > { %4725 = vst.msk [vmem:[%s7967_s14 + $0x60] sm:$0xff] %vm4712_vm8, %v5817_v57  ;;  %v5819_v15 = vadd.f32 %v4604_v36, %v1850_v35 }
 0x225   : > { %4728 = vst.msk [vmem:[%s7967_s14 + $0x78] sm:$0xff] %vm4712_vm8, %v5818_v5 }
 0x226   : > { %4726 = vst.msk [vmem:[%s7967_s14 + $0x68] sm:$0xff] %vm4712_vm8, %v5819_v15 }
 0x228   : > { %v5788_v50 = vpop.f32.mrb[16].mxu0 }
 0x229   : > { %v4617_v48 = vpop.f32.mrb[17].mxu0 }
 0x22a   : > { %v5652_v12 = vpop.f32.mrb[16].mxu1  ;;  %v5789_v40 = vpop.f32.mrb[18].mxu0 }
 0x22b   : > { %v5820_v7 = vadd.f32 %v5788_v50, %v5652_v12  ;;  %v2588_v56 = vpop.f32.mrb[17].mxu1  ;;  %v4620_v8 = vpop.f32.mrb[19].mxu0 }
 0x22c   : > { %v5821_v30 = vadd.f32 %v4617_v48, %v2588_v56  ;;  %v5653_v0 = vpop.f32.mrb[18].mxu1 }
 0x22d   : > { %4731 = vst.msk [vmem:[%s7967_s14 + $0x90] sm:$0xff] %vm4712_vm8, %v5820_v7  ;;  %v5822_v42 = vadd.f32 %v5789_v40, %v5653_v0  ;;  %v2591_v26 = vpop.f32.mrb[19].mxu1 }
 0x22e   : > { %4729 = vst.msk [vmem:[%s7967_s14 + $0x80] sm:$0xff] %vm4712_vm8, %v5821_v30  ;;  %v5823_v51 = vadd.f32 %v4620_v8, %v2591_v26 }
 0x22f   : > { %4732 = vst.msk [vmem:[%s7967_s14 + $0x98] sm:$0xff] %vm4712_vm8, %v5822_v42 }
 0x230   : > { %4730 = vst.msk [vmem:[%s7967_s14 + $0x88] sm:$0xff] %vm4712_vm8, %v5823_v51  ;;  %v5792_v55 = vpop.f32.mrb[20].mxu0 }
 0x231   : > { %v4633_v1 = vpop.f32.mrb[21].mxu0 }
 0x232   : > { %v5656_v21 = vpop.f32.mrb[20].mxu1  ;;  %v5793_v17 = vpop.f32.mrb[22].mxu0 }
 0x233   : > { %v5824_v11 = vadd.f32 %v5792_v55, %v5656_v21  ;;  %v2604_v2 = vpop.f32.mrb[21].mxu1  ;;  %v4636_v59 = vpop.f32.mrb[23].mxu0 }
 0x234   : > { %v5825_v62 = vadd.f32 %v4633_v1, %v2604_v2  ;;  %v5657_v27 = vpop.f32.mrb[22].mxu1 }
 0x235   : > { %4735 = vst.msk [vmem:[%s7967_s14 + $0xb0] sm:$0xff] %vm4712_vm8, %v5824_v11  ;;  %v5826_v37 = vadd.f32 %v5793_v17, %v5657_v27  ;;  %v2607_v9 = vpop.f32.mrb[23].mxu1 }
 0x236   : > { %4733 = vst.msk [vmem:[%s7967_s14 + $0xa0] sm:$0xff] %vm4712_vm8, %v5825_v62  ;;  %v5827_v6 = vadd.f32 %v4636_v59, %v2607_v9 }
 0x237   : > { %4736 = vst.msk [vmem:[%s7967_s14 + $0xb8] sm:$0xff] %vm4712_vm8, %v5826_v37 }
 0x238   : > { %4734 = vst.msk [vmem:[%s7967_s14 + $0xa8] sm:$0xff] %vm4712_vm8, %v5827_v6  ;;  %v5796_v52 = vpop.f32.mrb[24].mxu0 }
 0x239   : > { %v4649_v54 = vpop.f32.mrb[25].mxu0 }
 0x23a   : > { %v5660_v34 = vpop.f32.mrb[24].mxu1  ;;  %v5797_v24 = vpop.f32.mrb[26].mxu0 }
 0x23b   : > { %v5828_v4 = vadd.f32 %v5796_v52, %v5660_v34  ;;  %v2620_v22 = vpop.f32.mrb[25].mxu1  ;;  %v4652_v53 = vpop.f32.mrb[27].mxu0 }
 0x23c   : > { %v5829_v20 = vadd.f32 %v4649_v54, %v2620_v22  ;;  %v5661_v35 = vpop.f32.mrb[26].mxu1 }
 0x23d   : > { %4739 = vst.msk [vmem:[%s7967_s14 + $0xd0] sm:$0xff] %vm4712_vm8, %v5828_v4  ;;  %v5830_v31 = vadd.f32 %v5797_v24, %v5661_v35  ;;  %v2623_v41 = vpop.f32.mrb[27].mxu1 }
 0x23e   : > { %4737 = vst.msk [vmem:[%s7967_s14 + $0xc0] sm:$0xff] %vm4712_vm8, %v5829_v20  ;;  %v5831_v39 = vadd.f32 %v4652_v53, %v2623_v41 }
 0x23f   : > { %4740 = vst.msk [vmem:[%s7967_s14 + $0xd8] sm:$0xff] %vm4712_vm8, %v5830_v31 }
 0x240   : > { %4738 = vst.msk [vmem:[%s7967_s14 + $0xc8] sm:$0xff] %vm4712_vm8, %v5831_v39  ;;  %v5800_v49 = vpop.f32.mrb[28].mxu0 }
 0x241   : > { %v4665_v23 = vpop.f32.mrb[29].mxu0 }
 0x242   : > { %v5664_v28 = vpop.f32.mrb[28].mxu1  ;;  %v5801_v46 = vpop.f32.mrb[30].mxu0 }
 0x243   : > { %v5832_v44 = vadd.f32 %v5800_v49, %v5664_v28  ;;  %v2636_v47 = vpop.f32.mrb[29].mxu1  ;;  %v4668_v38 = vpop.f32.mrb[31].mxu0 }
 0x244   : > { %v5833_v58 = vadd.f32 %v4665_v23, %v2636_v47  ;;  %v5665_v43 = vpop.f32.mrb[30].mxu1 }
 0x245   : > { %4743 = vst.msk [vmem:[%s7967_s14 + $0xf0] sm:$0xff] %vm4712_vm8, %v5832_v44  ;;  %v5834_v16 = vadd.f32 %v5801_v46, %v5665_v43  ;;  %v2639_v45 = vpop.f32.mrb[31].mxu1 }
 0x246   : > { %4741 = vst.msk [vmem:[%s7967_s14 + $0xe0] sm:$0xff] %vm4712_vm8, %v5833_v58  ;;  %v5835_v61 = vadd.f32 %v4668_v38, %v2639_v45 }
 0x247   : > { %4744 = vst.msk [vmem:[%s7967_s14 + $0xf8] sm:$0xff] %vm4712_vm8, %v5834_v16 }
 0x248   : > { %4742 = vst.msk [vmem:[%s7967_s14 + $0xe8] sm:$0xff] %vm4712_vm8, %v5835_v61 }
 0x249 PF: > { %s12_s9 = sadd.s32 1, %s6193_s9  }
 0x24a   : > { %p9_p4 = scmp.ge.s32.totalorder %s12_s9, 4  }
 0x24c   :  { %11 = sbr.rel (!%p9_p4) target bundleno = 1 (0x1), region = 60 }

</bundles_post_ra>
